<compile_context>
chip_gen: v7x
topology: tpu7x:2x2x1
jax: 0.10.0
libtpu: 0.0.40
codegen_flags: <defaults>
</compile_context>

<pallas_src>
import functools

import jax
import jax.numpy as jnp
from jax import lax
from jax.experimental import pallas as pl
from jax.experimental.pallas import tpu as pltpu

SOFT = 0.8


def _round_up(a, b):
    return (a + b - 1) // b * b


def _all_entropy_kernel(x1_ref, x2t_ref, x2lab_ref, out_ref,
                        m_scr, l_scr, s_scr, *, m_total, mask_cols, soft):
    """One (row-tile, col-tile) step of the online soft-target cross entropy.

    x1_ref    : (TN, D)   lhs rows (native dtype)
    x2t_ref   : (D, TM)   rhs columns, pre-transposed (native dtype)
    x2lab_ref : (TN, D)   x[train_set[:,1]] rows (gives the label logit)
    out_ref   : (TN, 128) per-row loss, broadcast across lanes (written last)
    m/l/s_scr : (TN, 1)   running max / sum(exp) / sum(pred)
    """
    j = pl.program_id(1)
    nj = pl.num_programs(1)

    @pl.when(j == 0)
    def _init():
        m_scr[...] = jnp.full_like(m_scr, -jnp.inf)
        l_scr[...] = jnp.zeros_like(l_scr)
        s_scr[...] = jnp.zeros_like(s_scr)

    # MXU matmul, f32 accumulation, operands in native (or bf16) dtype.
    pred = jnp.dot(x1_ref[...], x2t_ref[...],
                   preferred_element_type=jnp.float32)          # (TN, TM)

    if mask_cols:
        # Only compiled in when M was padded up to a tile multiple.
        tm = pred.shape[1]
        col = j * tm + lax.broadcasted_iota(jnp.int32, (1, tm), 1)
        valid = col < m_total
        pred_sm = jnp.where(valid, pred, -1e30)   # padded cols vanish in softmax
        pred_sum = jnp.where(valid, pred, 0.0)    # and contribute 0 to sum_pred
    else:
        pred_sm = pred
        pred_sum = pred

    # Online log-softmax statistics.
    tile_max = jnp.max(pred_sm, axis=1, keepdims=True)
    m_new = jnp.maximum(m_scr[...], tile_max)
    alpha = jnp.exp(m_scr[...] - m_new)
    l_scr[...] = alpha * l_scr[...] + jnp.sum(jnp.exp(pred_sm - m_new),
                                              axis=1, keepdims=True)
    s_scr[...] = s_scr[...] + jnp.sum(pred_sum, axis=1, keepdims=True)
    m_scr[...] = m_new

    @pl.when(j == nj - 1)
    def _finalize():
        # pred[i, label_i] == <x1_i, x[train_set[i,1]]>
        lab_logit = jnp.sum(
            x1_ref[...].astype(jnp.float32) * x2lab_ref[...].astype(jnp.float32),
            axis=1, keepdims=True)                               # (TN, 1)
        lse = m_scr[...] + jnp.log(l_scr[...])                   # log sum_j exp(pred)
        eps = (1.0 - soft) / (m_total - 1)
        # loss_i = -(soft-eps)*log_sm[i,label] - eps*sum_j log_sm[i,j]
        loss_rows = (-(soft - eps) * (lab_logit - lse)
                     - eps * (s_scr[...] - m_total * lse))       # (TN, 1)
        out_ref[...] = jnp.broadcast_to(loss_rows, out_ref.shape).astype(out_ref.dtype)


def all_entropy_loss(train_set, x, e2, *, tn=256, tm=512, operand_dtype=None):
    """JAX wrapper reproducing ALL_entroy.forward(train_set, x, e2).

    Tile-size guidance per generation (pass via tn/tm):
      v7x : tn=256,  tm=1024   (64 MiB VMEM, 2 TCs -> keep N axis 'parallel')
      v6e : tn=512,  tm=2048+  (128 MiB VMEM; raise vmem_limit_bytes if needed)
      v5e : tn=256,  tm=1024   (16 MiB default scoped VMEM, weaker EUP)
    operand_dtype=jnp.bfloat16 gives ~2x+ MXU throughput (softmax math stays f32).
    """
    train_set = train_set.astype(jnp.int32)
    e2 = e2.astype(jnp.int32)

    # Index-plumbing glue (gathers) in plain JAX; the hot path runs in the kernel.
    x1 = x[train_set[:, 0]]            # [N, D]
    x2 = x[e2]                         # [M, D]
    x2lab = x[train_set[:, 1]]         # [N, D] == x2[label]  (train_set[:,1] must be in e2)

    n, d = x1.shape
    m = x2.shape[0]
    # NOTE: m == 1 is undefined in the original module too (division by m-1).

    # Clamp tiles to sensible/aligned sizes for tiny problems.
    tn = max(8, min(int(tn), _round_up(n, 8)))
    tm = max(128, min(int(tm), _round_up(m, 128)))
    n_pad = _round_up(n, tn)
    m_pad = _round_up(m, tm)

    x1p = jnp.pad(x1, ((0, n_pad - n), (0, 0)))
    x2labp = jnp.pad(x2lab, ((0, n_pad - n), (0, 0)))
    x2t = jnp.pad(x2, ((0, m_pad - m), (0, 0))).T          # [D, M_pad], lane-dense rhs

    if operand_dtype is not None:
        x1p = x1p.astype(operand_dtype)
        x2labp = x2labp.astype(operand_dtype)
        x2t = x2t.astype(operand_dtype)

    kernel = functools.partial(
        _all_entropy_kernel, m_total=m, mask_cols=(m_pad != m), soft=SOFT)

    grid = (n_pad // tn, m_pad // tm)

    out = pl.pallas_call(
        kernel,
        out_shape=jax.ShapeDtypeStruct((n_pad, 128), jnp.float32),
        grid_spec=pltpu.PrefetchScalarGridSpec(
            num_scalar_prefetch=0,
            grid=grid,
            in_specs=[
                pl.BlockSpec((tn, d), lambda i, j: (i, 0)),   # x1 rows
                pl.BlockSpec((d, tm), lambda i, j: (0, j)),   # x2^T columns
                pl.BlockSpec((tn, d), lambda i, j: (i, 0)),   # label rows
            ],
            out_specs=pl.BlockSpec((tn, 128), lambda i, j: (i, 0)),
            scratch_shapes=[pltpu.VMEM((tn, 1), jnp.float32)] * 3,
        ),
        compiler_params=pltpu.CompilerParams(
            dimension_semantics=("parallel", "arbitrary")),
    )(x1p, x2t, x2labp)

    row_loss = out[:n, 0]
    return jnp.mean(row_loss)


def _reference_loss(train_set, x, e2):
    """Pure-JAX reference for sanity checking."""
    x1 = x[train_set[:, 0]]
    x2 = x[e2]
    pred = x1 @ x2.T
    labels = jnp.argmax(e2[None, :] == train_set[:, 1:2], axis=1)
    m = x2.shape[0]
    onehot = jax.nn.one_hot(labels, m, dtype=jnp.float32)
    st = onehot * SOFT + (1.0 - onehot) * ((1.0 - SOFT) / (m - 1))
    log_sm = jax.nn.log_softmax(pred, axis=1)
    return jnp.mean(jnp.sum(-st * log_sm, axis=1))


if __name__ == "__main__":
    key = jax.random.PRNGKey(0)
    k1, k2, k3, k4 = jax.random.split(key, 4)

    # Small but non-tile-aligned shapes to exercise the padded/masked paths.
    V, D, N, M = 1024, 96, 200, 700   # entities, embed dim, train pairs, candidates

    x = jax.random.normal(k1, (V, D), jnp.float32)
    e2 = jax.random.permutation(k2, V)[:M].astype(jnp.int32)        # candidate entity ids
    # train_set[:, 1] must come from e2 (so the label lookup is well-defined)
    col1 = e2[jax.random.permutation(k3, M)[:N]]
    col0 = jax.random.randint(k4, (N,), 0, V, dtype=jnp.int32)
    train_set = jnp.stack([col0, col1], axis=1)

    loss = all_entropy_loss(train_set, x, e2, tn=128, tm=256)
    jax.block_until_ready(loss)

    ref = _reference_loss(train_set, x, e2)
    assert jnp.allclose(loss, ref, atol=1e-4, rtol=1e-4), (loss, ref)

    print("KERNEL_OK")
</pallas_src>

<mosaic_0001>
module attributes {stable_mosaic.version = 11 : i64} {
  func.func @_all_entropy_kernel(%arg0: i32, %arg1: i32, %arg2: memref<128x96xf32, #tpu.memory_space<vmem>>, %arg3: memref<96x256xf32, #tpu.memory_space<vmem>>, %arg4: memref<128x96xf32, #tpu.memory_space<vmem>>, %arg5: memref<128x128xf32, #tpu.memory_space<vmem>>, %arg6: memref<128x1xf32, #tpu.memory_space<vmem>>, %arg7: memref<128x1xf32, #tpu.memory_space<vmem>>, %arg8: memref<128x1xf32, #tpu.memory_space<vmem>>) attributes {dimension_semantics = [#tpu.dimension_semantics<parallel>, #tpu.dimension_semantics<arbitrary>], iteration_bounds = array<i64: 2, 3>, scalar_prefetch = 0 : i64, scratch_operands = 3 : i64, tpu.core_type = #tpu.core_type<tc>, window_params = [{transform_indices = @transform_0, window_bounds = array<i64: 128, 96>}, {transform_indices = @transform_1, window_bounds = array<i64: 96, 256>}, {transform_indices = @transform_2, window_bounds = array<i64: 128, 96>}, {transform_indices = @transform_3, window_bounds = array<i64: 128, 128>}]} {
    %c0_i32 = arith.constant 0 : i32
    %0 = arith.cmpi eq, %arg1, %c0_i32 : i32
    %1 = arith.extui %0 : i1 to i32
    %c0_i32_0 = arith.constant 0 : i32
    %2 = arith.cmpi ne, %1, %c0_i32_0 : i32
    scf.if %2 {
      %cst_24 = arith.constant 0xFF800000 : f32
      %45 = vector.broadcast %cst_24 : f32 to vector<128x1xf32>
      %c0_25 = arith.constant 0 : index
      %c0_26 = arith.constant 0 : index
      %46 = vector.load %arg6[%c0_25, %c0_26] : memref<128x1xf32, #tpu.memory_space<vmem>>, vector<128x1xf32>
      tpu.vector_store %arg6[%c0_25, %c0_26], %45 {strides = array<i32>} : memref<128x1xf32, #tpu.memory_space<vmem>>, vector<128x1xf32>,
      %cst_27 = arith.constant 0.000000e+00 : f32
      %47 = vector.broadcast %cst_27 : f32 to vector<128x1xf32>
      %c0_28 = arith.constant 0 : index
      %c0_29 = arith.constant 0 : index
      %48 = vector.load %arg7[%c0_28, %c0_29] : memref<128x1xf32, #tpu.memory_space<vmem>>, vector<128x1xf32>
      tpu.vector_store %arg7[%c0_28, %c0_29], %47 {strides = array<i32>} : memref<128x1xf32, #tpu.memory_space<vmem>>, vector<128x1xf32>,
      %cst_30 = arith.constant 0.000000e+00 : f32
      %49 = vector.broadcast %cst_30 : f32 to vector<128x1xf32>
      %c0_31 = arith.constant 0 : index
      %c0_32 = arith.constant 0 : index
      %50 = vector.load %arg8[%c0_31, %c0_32] : memref<128x1xf32, #tpu.memory_space<vmem>>, vector<128x1xf32>
      tpu.vector_store %arg8[%c0_31, %c0_32], %49 {strides = array<i32>} : memref<128x1xf32, #tpu.memory_space<vmem>>, vector<128x1xf32>,
    } else {
    }
    %c0 = arith.constant 0 : index
    %c0_1 = arith.constant 0 : index
    %3 = vector.load %arg2[%c0, %c0_1] : memref<128x96xf32, #tpu.memory_space<vmem>>, vector<128x96xf32>
    %c0_2 = arith.constant 0 : index
    %c0_3 = arith.constant 0 : index
    %4 = vector.load %arg3[%c0_2, %c0_3] : memref<96x256xf32, #tpu.memory_space<vmem>>, vector<96x256xf32>
    %cst = arith.constant dense<0.000000e+00> : vector<128x256xf32>
    %5 = tpu.matmul %3, %4, %cst {dimension_numbers = #tpu.dot_dimension_numbers<[1], [0], [0], [1], [0, 0, 1, 1], [], []>} : vector<128x96xf32>, vector<96x256xf32>, vector<128x256xf32> -> vector<128x256xf32>
    %c256_i32 = arith.constant 256 : i32
    %6 = arith.muli %arg1, %c256_i32 : i32
    %7 = tpu.iota {dimensions = array<i32: 1>} : vector<1x256xi32>
    %8 = vector.broadcast %6 : i32 to vector<1x256xi32>
    %9 = arith.addi %8, %7 : vector<1x256xi32>
    %c700_i32 = arith.constant 700 : i32
    %10 = vector.broadcast %c700_i32 : i32 to vector<1x256xi32>
    %11 = arith.cmpi slt, %9, %10 : vector<1x256xi32>
    %cst_4 = arith.constant -1.000000e+30 : f32
    %12 = vector.shape_cast %11 : vector<1x256xi1> to vector<1x256xi1>
    %13 = vector.broadcast %12 : vector<1x256xi1> to vector<128x256xi1>
    %14 = vector.broadcast %cst_4 : f32 to vector<128x256xf32>
    %15 = arith.select %13, %5, %14 : vector<128x256xi1>, vector<128x256xf32>
    %cst_5 = arith.constant 0.000000e+00 : f32
    %16 = vector.shape_cast %11 : vector<1x256xi1> to vector<1x256xi1>
    %17 = vector.broadcast %16 : vector<1x256xi1> to vector<128x256xi1>
    %18 = vector.broadcast %cst_5 : f32 to vector<128x256xf32>
    %19 = arith.select %17, %5, %18 : vector<128x256xi1>, vector<128x256xf32>
    %cst_6 = arith.constant dense<0xFF800000> : vector<128xf32>
    %20 = vector.multi_reduction <maximumf>, %15, %cst_6 [1] : vector<128x256xf32> to vector<128xf32>
    %21 = vector.shape_cast %20 : vector<128xf32> to vector<128x1xf32>
    %c0_7 = arith.constant 0 : index
    %c0_8 = arith.constant 0 : index
    %22 = vector.load %arg6[%c0_7, %c0_8] : memref<128x1xf32, #tpu.memory_space<vmem>>, vector<128x1xf32>
    %23 = arith.maximumf %22, %21 : vector<128x1xf32>
    %c0_9 = arith.constant 0 : index
    %c0_10 = arith.constant 0 : index
    %24 = vector.load %arg6[%c0_9, %c0_10] : memref<128x1xf32, #tpu.memory_space<vmem>>, vector<128x1xf32>
    %25 = arith.subf %24, %23 : vector<128x1xf32>
    %26 = math.exp %25 : vector<128x1xf32>
    %c0_11 = arith.constant 0 : index
    %c0_12 = arith.constant 0 : index
    %27 = vector.load %arg7[%c0_11, %c0_12] : memref<128x1xf32, #tpu.memory_space<vmem>>, vector<128x1xf32>
    %28 = arith.mulf %26, %27 : vector<128x1xf32>
    %29 = vector.broadcast %23 : vector<128x1xf32> to vector<128x256xf32>
    %30 = arith.subf %15, %29 : vector<128x256xf32>
    %31 = math.exp %30 : vector<128x256xf32>
    %cst_13 = arith.constant dense<0.000000e+00> : vector<128xf32>
    %32 = vector.multi_reduction <add>, %31, %cst_13 [1] : vector<128x256xf32> to vector<128xf32>
    %33 = vector.shape_cast %32 : vector<128xf32> to vector<128x1xf32>
    %34 = arith.addf %28, %33 : vector<128x1xf32>
    %c0_14 = arith.constant 0 : index
    %c0_15 = arith.constant 0 : index
    %35 = vector.load %arg7[%c0_14, %c0_15] : memref<128x1xf32, #tpu.memory_space<vmem>>, vector<128x1xf32>
    tpu.vector_store %arg7[%c0_14, %c0_15], %34 {strides = array<i32>} : memref<128x1xf32, #tpu.memory_space<vmem>>, vector<128x1xf32>,
    %c0_16 = arith.constant 0 : index
    %c0_17 = arith.constant 0 : index
    %36 = vector.load %arg8[%c0_16, %c0_17] : memref<128x1xf32, #tpu.memory_space<vmem>>, vector<128x1xf32>
    %cst_18 = arith.constant dense<0.000000e+00> : vector<128xf32>
    %37 = vector.multi_reduction <add>, %19, %cst_18 [1] : vector<128x256xf32> to vector<128xf32>
    %38 = vector.shape_cast %37 : vector<128xf32> to vector<128x1xf32>
    %39 = arith.addf %36, %38 : vector<128x1xf32>
    %c0_19 = arith.constant 0 : index
    %c0_20 = arith.constant 0 : index
    %40 = vector.load %arg8[%c0_19, %c0_20] : memref<128x1xf32, #tpu.memory_space<vmem>>, vector<128x1xf32>
    tpu.vector_store %arg8[%c0_19, %c0_20], %39 {strides = array<i32>} : memref<128x1xf32, #tpu.memory_space<vmem>>, vector<128x1xf32>,
    %c0_21 = arith.constant 0 : index
    %c0_22 = arith.constant 0 : index
    %41 = vector.load %arg6[%c0_21, %c0_22] : memref<128x1xf32, #tpu.memory_space<vmem>>, vector<128x1xf32>
    tpu.vector_store %arg6[%c0_21, %c0_22], %23 {strides = array<i32>} : memref<128x1xf32, #tpu.memory_space<vmem>>, vector<128x1xf32>,
    %c2_i32 = arith.constant 2 : i32
    %42 = arith.cmpi eq, %arg1, %c2_i32 : i32
    %43 = arith.extui %42 : i1 to i32
    %c0_i32_23 = arith.constant 0 : i32
    %44 = arith.cmpi ne, %43, %c0_i32_23 : i32
    scf.if %44 {
      %c0_24 = arith.constant 0 : index
      %c0_25 = arith.constant 0 : index
      %45 = vector.load %arg2[%c0_24, %c0_25] : memref<128x96xf32, #tpu.memory_space<vmem>>, vector<128x96xf32>
      %c0_26 = arith.constant 0 : index
      %c0_27 = arith.constant 0 : index
      %46 = vector.load %arg4[%c0_26, %c0_27] : memref<128x96xf32, #tpu.memory_space<vmem>>, vector<128x96xf32>
      %47 = arith.mulf %45, %46 : vector<128x96xf32>
      %cst_28 = arith.constant dense<0.000000e+00> : vector<128xf32>
      %48 = vector.multi_reduction <add>, %47, %cst_28 [1] : vector<128x96xf32> to vector<128xf32>
      %49 = vector.shape_cast %48 : vector<128xf32> to vector<128x1xf32>
      %c0_29 = arith.constant 0 : index
      %c0_30 = arith.constant 0 : index
      %50 = vector.load %arg6[%c0_29, %c0_30] : memref<128x1xf32, #tpu.memory_space<vmem>>, vector<128x1xf32>
      %c0_31 = arith.constant 0 : index
      %c0_32 = arith.constant 0 : index
      %51 = vector.load %arg7[%c0_31, %c0_32] : memref<128x1xf32, #tpu.memory_space<vmem>>, vector<128x1xf32>
      %52 = math.log %51 : vector<128x1xf32>
      %53 = arith.addf %50, %52 : vector<128x1xf32>
      %54 = arith.subf %49, %53 : vector<128x1xf32>
      %cst_33 = arith.constant -0.79971385 : f32
      %55 = vector.broadcast %cst_33 : f32 to vector<128x1xf32>
      %56 = arith.mulf %55, %54 : vector<128x1xf32>
      %c0_34 = arith.constant 0 : index
      %c0_35 = arith.constant 0 : index
      %57 = vector.load %arg8[%c0_34, %c0_35] : memref<128x1xf32, #tpu.memory_space<vmem>>, vector<128x1xf32>
      %cst_36 = arith.constant 7.000000e+02 : f32
      %58 = vector.broadcast %cst_36 : f32 to vector<128x1xf32>
      %59 = arith.mulf %58, %53 : vector<128x1xf32>
      %60 = arith.subf %57, %59 : vector<128x1xf32>
      %cst_37 = arith.constant 2.86123046E-4 : f32
      %61 = vector.broadcast %cst_37 : f32 to vector<128x1xf32>
      %62 = arith.mulf %61, %60 : vector<128x1xf32>
      %63 = arith.subf %56, %62 : vector<128x1xf32>
      %64 = vector.shape_cast %63 : vector<128x1xf32> to vector<128x1xf32>
      %65 = vector.broadcast %64 : vector<128x1xf32> to vector<128x128xf32>
      %c0_38 = arith.constant 0 : index
      %c0_39 = arith.constant 0 : index
      %66 = vector.load %arg5[%c0_38, %c0_39] : memref<128x128xf32, #tpu.memory_space<vmem>>, vector<128x128xf32>
      tpu.vector_store %arg5[%c0_38, %c0_39], %65 {strides = array<i32>} : memref<128x128xf32, #tpu.memory_space<vmem>>, vector<128x128xf32>,
    } else {
    }
    return
  }
  func.func @transform_0(%arg0: i32, %arg1: i32) -> (i32, i32) {
    %c0_i32 = arith.constant 0 : i32
    %c0_i32_0 = arith.constant 0 : i32
    return %arg0, %c0_i32 : i32, i32
  }
  func.func @transform_1(%arg0: i32, %arg1: i32) -> (i32, i32) {
    %c0_i32 = arith.constant 0 : i32
    %c0_i32_0 = arith.constant 0 : i32
    return %c0_i32, %arg1 : i32, i32
  }
  func.func @transform_2(%arg0: i32, %arg1: i32) -> (i32, i32) {
    %c0_i32 = arith.constant 0 : i32
    %c0_i32_0 = arith.constant 0 : i32
    return %arg0, %c0_i32 : i32, i32
  }
  func.func @transform_3(%arg0: i32, %arg1: i32) -> (i32, i32) {
    %c0_i32 = arith.constant 0 : i32
    %c0_i32_0 = arith.constant 0 : i32
    return %arg0, %c0_i32 : i32, i32
  }
}

</mosaic_0001>

<bundles_post_ra>
// kernel: tpu_custom_call.1
= control target key start
LH: loop header
LB: loop body
LE: loop exit
PB: predicated region body
PF: predicated region fallthrough
CT: control target
= control target key end

     0   :  { %s3158_s0 = inlined_call_operand.vmem [shape: f32[256,96], index: 0, kind: input, shape index: {}]   ;;  %s3159_s1 = inlined_call_operand.vmem [shape: f32[96,768], index: 1, kind: input, shape index: {}]   ;;  %s3160_s2 = inlined_call_operand.vmem [shape: f32[256,96], index: 2, kind: input, shape index: {}]   ;;  %s3161_s3 = inlined_call_operand.hbm [shape: f32[256,128], index: 3, kind: output, shape index: {}]  }
   0x1   :  { %3184 = sst [smem:[#allocation31_spill]] %s3159_s1 }
   0x2   :  { %8 = vsyncpa [#allocation7], 0 }
   0x3   :  { %10 = vsyncpa [#allocation7 + $0x1], 0  ;;  %s2149_s12 = smov 0   ;;  %s2151_s13 = smov 0  }
   0x4   :  { %s2153_s14 = smov 0   ;;  %s2155_s15 = smov 0  }
   0x5   :  { %s2157_s16 = smov 0   ;;  %s2159_s17 = smov 0  }
   0x6   :  { %s2161_s18 = smov 0   ;;  %s2163_s19 = smov 0  }
   0x7   :  { %s2165_s20 = smov 0   ;;  %s2167_s21 = smov 0  }
   0x8 LB: > { %s1707_s22 = sadd.s32 4294967295, %s2119_s21   ;;  %s1708_s23 = sadd.s32 4294967294, %s2119_s21   ;;  %s2119_s21 = sphi %s2167_s21, %s16_s21   ;;  %s2115_s20 = sphi %s2165_s20, %s3257_s20   ;;  %s2111_s19 = sphi %s2163_s19, %s3256_s19   ;;  %s2107_s18 = sphi %s2161_s18, %s3255_s18   ;;  %s2103_s17 = sphi %s2159_s17, %s3254_s17   ;;  %s2099_s16 = sphi %s2157_s16, %s3253_s16   ;;  %s2095_s15 = sphi %s2155_s15, %s3252_s15   ;;  %s2091_s14 = sphi %s2153_s14, %s3251_s14   ;;  %s2087_s13 = sphi %s2151_s13, %s3250_s13   ;;  %s2083_s12 = sphi %s2149_s12, %s3249_s12  }
   0x9   : > { %s25_s24 = sadd.s32 1, %s2111_s19  ;;  %s28_s25 = sadd.s32 1, %s2115_s20 }
   0xa   : > { %p26_p0 = scmp.ge.s32.totalorder %s25_s24, 3  ;;  %s61_s26 = sadd.s32 1, %s2099_s16 }
   0xb   : > { %p68_p1 = scmp.ne.s32.totalorder %s2099_s16, %s2095_s15  ;;  %p69_p2 = scmp.eq.s32.totalorder %s2119_s21, 0 }
   0xc   : > { %s3259_s24 = smov (%p26_p0, %s25_s24), 0  ;;  %s3261_s25 = smov (!%p26_p0, %s28_s25), %s2115_s20 }
   0xd   : > { %s58_s27 = ssub.s32 %s2111_s19, %s3259_s24  ;;  %p2212_p3 = por %p69_p2, %p68_p1 }
   0xe   : > { %p30_p4 = scmp.ge.s32.totalorder %s3261_s25, 2  ;;  %p59_p5 = scmp.eq.s32.totalorder %s58_s27, 0 }
   0xf   : > { %s113_s29 = sadd.s32 1, %s2091_s14  ;;  %p123_p6 = scmp.ne.s32.totalorder %s2091_s14, %s2087_s13 }
  0x10   : > { %s3263_s25 = smov (%p30_p4, %s3261_s25), 0  ;;  %p124_p7 = scmp.eq.s32.totalorder %s1707_s22, 5 }
  0x11   : > { %3186 = sst [smem:[#allocation9_spill]] %s3263_s25  ;;  %s110_s4 = ssub.s32 %s2115_s20, %s3263_s25 }
  0x12   : > { %s2222_s30 = scalar_select %p59_p5, %s2099_s16, %s61_s26  }
  0x13   : > { %p111_p8 = scmp.eq.s32.totalorder %s110_s4, 0  ;;  %p129_p9 = scmp.ne.s32.totalorder %s2087_s13, %s2083_s12 }
  0x14   : > { %p2228_p10 = por %p124_p7, %p123_p6  ;;  %p130_p11 = scmp.eq.s32.totalorder %s1708_s23, 5 }
  0x15   : > { %s2233_s6 = scalar_select %p111_p8, %s2091_s14, %s113_s29  }
  0x16   : > { %p2235_p12 = por %p130_p11, %p129_p9  ;;  %p1710_p13 = scmp.ge.s32.totalorder %s2119_s21, 6 }
  0x18   : > { %146 = sbr.rel (%p1710_p13) target bundleno = 54 (0x36), region = 16 }
  0x1f   : > { %158 = sbr.rel (!%p2212_p3) target bundleno = 54 (0x36), region = 24  ;;  %s160_s8 = sand.u32 (%p2212_p3), 1, %s2099_s16  }
  0x20   : > { %s1743_s9 = sshll.u32 (%p2212_p3), %s2111_s19, 4  ;;  %s1781_s10 = smul.u32 (%p2212_p3), 192, %s160_s8 }
  0x21   : > { %s3189_s1 = sld [smem:[#allocation31_spill]] (%p2212_p3) }
  0x22   : > { %s2255_s26 = scalar_lea.vmem (%p2212_p3), [#allocation5], %s1781_s10 }
  0x27   : > { %s2247_s23 = scalar_lea.vmem %s3189_s1, %s1743_s9 }
  0x28   : > { %v178_v0 = vld [vmem:[%s2247_s23] sm:$0xff]  ;;  %v180_v1 = vld [vmem:[%s2247_s23 + $0x8] sm:$0xff]  ;;  %v182_v2 = vld [vmem:[%s2247_s23 + $0x30] sm:$0xff] }
  0x29   : > { %v184_v3 = vld [vmem:[%s2247_s23 + $0x38] sm:$0xff]  ;;  %v186_v4 = vld [vmem:[%s2247_s23 + $0x60] sm:$0xff]  ;;  %v188_v5 = vld [vmem:[%s2247_s23 + $0x68] sm:$0xff]  ;;  %179 = vst [vmem:[%s2255_s26] sm:$0xff] %v178_v0 }
  0x2a   : > { %181 = vst [vmem:[%s2255_s26 + $0x8] sm:$0xff] %v180_v1  ;;  %183 = vst [vmem:[%s2255_s26 + $0x10] sm:$0xff] %v182_v2  ;;  %v190_v6 = vld [vmem:[%s2247_s23 + $0x90] sm:$0xff]  ;;  %v192_v7 = vld [vmem:[%s2247_s23 + $0x98] sm:$0xff] }
  0x2b   : > { %185 = vst [vmem:[%s2255_s26 + $0x18] sm:$0xff] %v184_v3  ;;  %187 = vst [vmem:[%s2255_s26 + $0x20] sm:$0xff] %v186_v4  ;;  %v194_v8 = vld [vmem:[%s2247_s23 + $0xc0] sm:$0xff]  ;;  %v196_v9 = vld [vmem:[%s2247_s23 + $0xc8] sm:$0xff] }
  0x2c   : > { %189 = vst [vmem:[%s2255_s26 + $0x28] sm:$0xff] %v188_v5  ;;  %191 = vst [vmem:[%s2255_s26 + $0x30] sm:$0xff] %v190_v6  ;;  %v198_v10 = vld [vmem:[%s2247_s23 + $0xf0] sm:$0xff]  ;;  %v200_v11 = vld [vmem:[%s2247_s23 + $0xf8] sm:$0xff] }
  0x2d   : > { %193 = vst [vmem:[%s2255_s26 + $0x38] sm:$0xff] %v192_v7  ;;  %195 = vst [vmem:[%s2255_s26 + $0x40] sm:$0xff] %v194_v8  ;;  %v202_v12 = vld [vmem:[%s2247_s23 + $0x120] sm:$0xff]  ;;  %v204_v13 = vld [vmem:[%s2247_s23 + $0x128] sm:$0xff] }
  0x2e   : > { %197 = vst [vmem:[%s2255_s26 + $0x48] sm:$0xff] %v196_v9  ;;  %199 = vst [vmem:[%s2255_s26 + $0x50] sm:$0xff] %v198_v10  ;;  %v206_v14 = vld [vmem:[%s2247_s23 + $0x150] sm:$0xff]  ;;  %v208_v15 = vld [vmem:[%s2247_s23 + $0x158] sm:$0xff] }
  0x2f   : > { %201 = vst [vmem:[%s2255_s26 + $0x58] sm:$0xff] %v200_v11  ;;  %203 = vst [vmem:[%s2255_s26 + $0x60] sm:$0xff] %v202_v12  ;;  %v210_v16 = vld [vmem:[%s2247_s23 + $0x180] sm:$0xff]  ;;  %v212_v17 = vld [vmem:[%s2247_s23 + $0x188] sm:$0xff] }
  0x30   : > { %205 = vst [vmem:[%s2255_s26 + $0x68] sm:$0xff] %v204_v13  ;;  %207 = vst [vmem:[%s2255_s26 + $0x70] sm:$0xff] %v206_v14  ;;  %v214_v18 = vld [vmem:[%s2247_s23 + $0x1b0] sm:$0xff]  ;;  %v216_v19 = vld [vmem:[%s2247_s23 + $0x1b8] sm:$0xff] }
  0x31   : > { %209 = vst [vmem:[%s2255_s26 + $0x78] sm:$0xff] %v208_v15  ;;  %211 = vst [vmem:[%s2255_s26 + $0x80] sm:$0xff] %v210_v16  ;;  %v218_v20 = vld [vmem:[%s2247_s23 + $0x1e0] sm:$0xff]  ;;  %v220_v21 = vld [vmem:[%s2247_s23 + $0x1e8] sm:$0xff] }
  0x32   : > { %213 = vst [vmem:[%s2255_s26 + $0x88] sm:$0xff] %v212_v17  ;;  %215 = vst [vmem:[%s2255_s26 + $0x90] sm:$0xff] %v214_v18  ;;  %v222_v22 = vld [vmem:[%s2247_s23 + $0x210] sm:$0xff]  ;;  %v224_v23 = vld [vmem:[%s2247_s23 + $0x218] sm:$0xff] }
  0x33   : > { %217 = vst [vmem:[%s2255_s26 + $0x98] sm:$0xff] %v216_v19  ;;  %219 = vst [vmem:[%s2255_s26 + $0xa0] sm:$0xff] %v218_v20 }
  0x34   : > { %221 = vst [vmem:[%s2255_s26 + $0xa8] sm:$0xff] %v220_v21  ;;  %223 = vst [vmem:[%s2255_s26 + $0xb0] sm:$0xff] %v222_v22 }
  0x35   : > { %225 = vst [vmem:[%s2255_s26 + $0xb8] sm:$0xff] %v224_v23 }
  0x36 PF: > { %p1713_p0 = scmp.ge.s32.totalorder %s2119_s21, 1  ;;  %p239_p1 = scmp.lt.s32.totalorder %s2119_s21, 7 }
  0x38   : > { %p240_p2 = pnand %p1713_p0, %p239_p1 }
  0x3a   : > { %243 = sbr.rel (%p240_p2) target bundleno = 1142 (0x476), region = 51 }
  0x41   : > { %s246_s27 = sand.u32 1, %s2095_s15   ;;  %s276_s28 = sand.u32 1, %s2087_s13  }
  0x42   : > { %s1782_s29 = smul.u32 192, %s246_s27  ;;  %s1714_s4 = sshll.u32 %s276_s28, 7 }
  0x43   : > { %s1715_s8 = sshll.u32 %s2107_s18, 4  ;;  %s2318_s15 = scalar_lea.vmem [#allocation6], %s1714_s4 }
  0x44   : > { %p280_p3 = scmp.lt.s32.totalorder %s1715_s8, 31  ;;  %s2316_s25 = scalar_lea.vmem [#allocation5], %s1782_s29 }
  0x45   : > { %p1719_p4 = scmp.ne.s32.totalorder %s2103_s17, 0 }
  0x46   : > { %s3265_s8 = smov (!%p280_p3, %s1715_s8), 31  ;;  %vm297_vm0 = vcmask (!%p1719_p4), 7168   ;;  %v2121_v24 = vmov (!%p1719_p4), -inf   ;;  %v2122_v25 = vmov (!%p1719_p4), 0.0  }
  0x47   : > { %s1716_s9 = sshll.u32 %s3265_s8, 3  ;;  %296 = sbr.rel (%p1719_p4) target bundleno = 95 (0x5f), region = 59  ;;  %298 = vst.msk [vmem:[#allocation2] sm:$0xff] (!%p1719_p4), %vm297_vm0, %v2121_v24  ;;  %299 = vst.msk [vmem:[#allocation2 + $0x8] sm:$0xff] (!%p1719_p4), %vm297_vm0, %v2121_v24 }
  0x48   : > { %s2309_s22 = scalar_lea.vmem %s3158_s0, %s1716_s9  ;;  %s2314_s1 = scalar_lea.vmem %s3160_s2, %s1716_s9  ;;  %300 = vst.msk [vmem:[#allocation2 + $0x10] sm:$0xff] (!%p1719_p4), %vm297_vm0, %v2121_v24  ;;  %301 = vst.msk [vmem:[#allocation2 + $0x18] sm:$0xff] (!%p1719_p4), %vm297_vm0, %v2121_v24 }
  0x49   : > { %302 = vst.msk [vmem:[#allocation2 + $0x20] sm:$0xff] (!%p1719_p4), %vm297_vm0, %v2121_v24  ;;  %303 = vst.msk [vmem:[#allocation2 + $0x28] sm:$0xff] (!%p1719_p4), %vm297_vm0, %v2121_v24 }
  0x4a   : > { %304 = vst.msk [vmem:[#allocation2 + $0x30] sm:$0xff] (!%p1719_p4), %vm297_vm0, %v2121_v24  ;;  %305 = vst.msk [vmem:[#allocation2 + $0x38] sm:$0xff] (!%p1719_p4), %vm297_vm0, %v2121_v24 }
  0x4b   : > { %306 = vst.msk [vmem:[#allocation2 + $0x40] sm:$0xff] (!%p1719_p4), %vm297_vm0, %v2121_v24  ;;  %307 = vst.msk [vmem:[#allocation2 + $0x48] sm:$0xff] (!%p1719_p4), %vm297_vm0, %v2121_v24 }
  0x4c   : > { %308 = vst.msk [vmem:[#allocation2 + $0x50] sm:$0xff] (!%p1719_p4), %vm297_vm0, %v2121_v24  ;;  %309 = vst.msk [vmem:[#allocation2 + $0x58] sm:$0xff] (!%p1719_p4), %vm297_vm0, %v2121_v24 }
  0x4d   : > { %310 = vst.msk [vmem:[#allocation2 + $0x60] sm:$0xff] (!%p1719_p4), %vm297_vm0, %v2121_v24  ;;  %311 = vst.msk [vmem:[#allocation2 + $0x68] sm:$0xff] (!%p1719_p4), %vm297_vm0, %v2121_v24 }
  0x4e   : > { %312 = vst.msk [vmem:[#allocation2 + $0x70] sm:$0xff] %vm297_vm0, %v2121_v24  ;;  %313 = vst.msk [vmem:[#allocation2 + $0x78] sm:$0xff] %vm297_vm0, %v2121_v24 }
  0x4f   : > { %314 = vst.msk [vmem:[#allocation3] sm:$0xff] %vm297_vm0, %v2122_v25  ;;  %315 = vst.msk [vmem:[#allocation3 + $0x8] sm:$0xff] %vm297_vm0, %v2122_v25 }
  0x50   : > { %316 = vst.msk [vmem:[#allocation3 + $0x10] sm:$0xff] %vm297_vm0, %v2122_v25  ;;  %317 = vst.msk [vmem:[#allocation3 + $0x18] sm:$0xff] %vm297_vm0, %v2122_v25 }
  0x51   : > { %318 = vst.msk [vmem:[#allocation3 + $0x20] sm:$0xff] %vm297_vm0, %v2122_v25  ;;  %319 = vst.msk [vmem:[#allocation3 + $0x28] sm:$0xff] %vm297_vm0, %v2122_v25 }
  0x52   : > { %320 = vst.msk [vmem:[#allocation3 + $0x30] sm:$0xff] %vm297_vm0, %v2122_v25  ;;  %321 = vst.msk [vmem:[#allocation3 + $0x38] sm:$0xff] %vm297_vm0, %v2122_v25 }
  0x53   : > { %322 = vst.msk [vmem:[#allocation3 + $0x40] sm:$0xff] %vm297_vm0, %v2122_v25  ;;  %323 = vst.msk [vmem:[#allocation3 + $0x48] sm:$0xff] %vm297_vm0, %v2122_v25 }
  0x54   : > { %324 = vst.msk [vmem:[#allocation3 + $0x50] sm:$0xff] %vm297_vm0, %v2122_v25  ;;  %325 = vst.msk [vmem:[#allocation3 + $0x58] sm:$0xff] %vm297_vm0, %v2122_v25 }
  0x55   : > { %326 = vst.msk [vmem:[#allocation3 + $0x60] sm:$0xff] %vm297_vm0, %v2122_v25  ;;  %327 = vst.msk [vmem:[#allocation3 + $0x68] sm:$0xff] %vm297_vm0, %v2122_v25 }
  0x56   : > { %328 = vst.msk [vmem:[#allocation3 + $0x70] sm:$0xff] %vm297_vm0, %v2122_v25  ;;  %329 = vst.msk [vmem:[#allocation3 + $0x78] sm:$0xff] %vm297_vm0, %v2122_v25 }
  0x57   : > { %330 = vst.msk [vmem:[#allocation4] sm:$0xff] %vm297_vm0, %v2122_v25  ;;  %331 = vst.msk [vmem:[#allocation4 + $0x8] sm:$0xff] %vm297_vm0, %v2122_v25 }
  0x58   : > { %332 = vst.msk [vmem:[#allocation4 + $0x10] sm:$0xff] %vm297_vm0, %v2122_v25  ;;  %333 = vst.msk [vmem:[#allocation4 + $0x18] sm:$0xff] %vm297_vm0, %v2122_v25 }
  0x59   : > { %334 = vst.msk [vmem:[#allocation4 + $0x20] sm:$0xff] %vm297_vm0, %v2122_v25  ;;  %335 = vst.msk [vmem:[#allocation4 + $0x28] sm:$0xff] %vm297_vm0, %v2122_v25 }
  0x5a   : > { %336 = vst.msk [vmem:[#allocation4 + $0x30] sm:$0xff] %vm297_vm0, %v2122_v25  ;;  %337 = vst.msk [vmem:[#allocation4 + $0x38] sm:$0xff] %vm297_vm0, %v2122_v25 }
  0x5b   : > { %338 = vst.msk [vmem:[#allocation4 + $0x40] sm:$0xff] %vm297_vm0, %v2122_v25  ;;  %339 = vst.msk [vmem:[#allocation4 + $0x48] sm:$0xff] %vm297_vm0, %v2122_v25 }
  0x5c   : > { %340 = vst.msk [vmem:[#allocation4 + $0x50] sm:$0xff] %vm297_vm0, %v2122_v25  ;;  %341 = vst.msk [vmem:[#allocation4 + $0x58] sm:$0xff] %vm297_vm0, %v2122_v25 }
  0x5d   : > { %342 = vst.msk [vmem:[#allocation4 + $0x60] sm:$0xff] %vm297_vm0, %v2122_v25  ;;  %343 = vst.msk [vmem:[#allocation4 + $0x68] sm:$0xff] %vm297_vm0, %v2122_v25 }
  0x5e   : > { %344 = vst.msk [vmem:[#allocation4 + $0x70] sm:$0xff] %vm297_vm0, %v2122_v25  ;;  %345 = vst.msk [vmem:[#allocation4 + $0x78] sm:$0xff] %vm297_vm0, %v2122_v25 }
  0x5f PF: > { %v363_v26 = vld [vmem:[%s2316_s25 + $0x8] sm:$0xff]  ;;  %v365_v27 = vld [vmem:[%s2316_s25 + $0x18] sm:$0xff]  ;;  %v362_v28 = vld [vmem:[%s2316_s25] sm:$0xff]  ;;  %v2123_v33 = vmov 0.0   ;;  %vm386_vm1 = vcmask 785408   ;;  %v597_v15 = vlaneseq  ;;  %vm1073_vm4 = vcmask 7168  }
  0x60   : > { %v1745_v29 = vpack.c.bf16 %v365_v27, %v363_v26  ;;  %v364_v30 = vld [vmem:[%s2316_s25 + $0x10] sm:$0xff]  ;;  %v367_v31 = vld [vmem:[%s2316_s25 + $0x28] sm:$0xff]  ;;  %v369_v32 = vld [vmem:[%s2316_s25 + $0x38] sm:$0xff]  ;;  %499 = vmatprep.mubr.f32.mxu0 %v2123_v33  ;;  %547 = vmatprep.mubr.f32.mxu1 %v2123_v33  ;;  %p1737_p5 = scmp.ne.s32.totalorder %s2103_s17, 2 }
  0x61   : > { %v1747_v34 = vpack.c.bf16 %v364_v30, %v362_v28  ;;  %v1749_v35 = vpack.c.bf16 %v369_v32, %v367_v31  ;;  %v366_v36 = vld [vmem:[%s2316_s25 + $0x20] sm:$0xff]  ;;  %v368_v37 = vld [vmem:[%s2316_s25 + $0x30] sm:$0xff]  ;;  %v371_v38 = vld [vmem:[%s2316_s25 + $0x48] sm:$0xff]  ;;  %v598_v16 = vand.u32 127, %v597_v15 }
  0x62   : > { %1746 = vmatprep.subr.bf16.mxu0 %v1745_v29  ;;  %1769 = vmatprep.subr.bf16.mxu1 %v1745_v29  ;;  %v373_v39 = vld [vmem:[%s2316_s25 + $0x58] sm:$0xff]  ;;  %v1751_v40 = vpack.c.bf16 %v368_v37, %v366_v36  ;;  %v370_v42 = vld [vmem:[%s2316_s25 + $0x40] sm:$0xff]  ;;  %v372_v43 = vld [vmem:[%s2316_s25 + $0x50] sm:$0xff] }
  0x63   : > { %1748 = vmatpush1.bf16.msra.mxu0 %v1747_v34  ;;  %1775 = vmatpush1.bf16.msra.mxu1 %v1747_v34  ;;  %v1753_v41 = vpack.c.bf16 %v373_v39, %v371_v38  ;;  %v375_v44 = vld [vmem:[%s2316_s25 + $0x68] sm:$0xff]  ;;  %v377_v45 = vld [vmem:[%s2316_s25 + $0x78] sm:$0xff]  ;;  %v1755_v46 = vpack.c.bf16 %v372_v43, %v370_v42  ;;  %v374_v48 = vld [vmem:[%s2316_s25 + $0x60] sm:$0xff]  ;;  %v599_v18 = vadd.s32 128, %v598_v16 }
  0x64   : > { %1750 = vmatprep.subr.bf16.mxu0 %v1749_v35  ;;  %1770 = vmatprep.subr.bf16.mxu1 %v1749_v35  ;;  %v1757_v47 = vpack.c.bf16 %v377_v45, %v375_v44  ;;  %v376_v49 = vld [vmem:[%s2316_s25 + $0x70] sm:$0xff]  ;;  %v379_v50 = vld [vmem:[%s2316_s25 + $0x88] sm:$0xff]  ;;  %v381_v51 = vld [vmem:[%s2316_s25 + $0x98] sm:$0xff] }
  0x65   : > { %v1759_v52 = vpack.c.bf16 %v376_v49, %v374_v48  ;;  %v1761_v53 = vpack.c.bf16 %v381_v51, %v379_v50  ;;  %v378_v54 = vld [vmem:[%s2316_s25 + $0x80] sm:$0xff]  ;;  %v380_v55 = vld [vmem:[%s2316_s25 + $0x90] sm:$0xff]  ;;  %v383_v56 = vld [vmem:[%s2316_s25 + $0xa8] sm:$0xff] }
  0x66   : > { %v385_v57 = vld [vmem:[%s2316_s25 + $0xb8] sm:$0xff]  ;;  %v1763_v58 = vpack.c.bf16 %v380_v55, %v378_v54  ;;  %v382_v60 = vld [vmem:[%s2316_s25 + $0xa0] sm:$0xff]  ;;  %v384_v61 = vld [vmem:[%s2316_s25 + $0xb0] sm:$0xff]  ;;  %s1736_s25 = sshll.u32 %s2103_s17, 8 }
  0x67   : > { %1752 = vmatpush1.bf16.msra.mxu0 %v1751_v40  ;;  %1776 = vmatpush1.bf16.msra.mxu1 %v1751_v40  ;;  %v1765_v59 = vpack.c.bf16 %v385_v57, %v383_v56  ;;  %v1767_v62 = vpack.c.bf16 %v384_v61, %v382_v60  ;;  %v346_v63 = vld [vmem:[%s2309_s22] sm:$0xff]  ;;  %v347_v1 = vld [vmem:[%s2309_s22 + $0x8] sm:$0xff]  ;;  %v348_v3 = vld [vmem:[%s2309_s22 + $0x10] sm:$0xff]  ;;  %v600_v17 = vstv %s1736_s25 }
  0x68   : > { %1754 = vmatprep.subr.bf16.mxu0 %v1753_v41  ;;  %1771 = vmatprep.subr.bf16.mxu1 %v1753_v41  ;;  %v354_v0 = vld [vmem:[%s2309_s22 + $0x40] sm:$0xff]  ;;  %v355_v2 = vld [vmem:[%s2309_s22 + $0x48] sm:$0xff]  ;;  %v356_v4 = vld [vmem:[%s2309_s22 + $0x50] sm:$0xff]  ;;  %v2442_v19 = vadd.s32 %v600_v17, %v598_v16  ;;  %v2444_v20 = vadd.s32 %v600_v17, %v599_v18 }
  0x69   : > { %v349_v5 = vld [vmem:[%s2309_s22 + $0x18] sm:$0xff]  ;;  %v350_v7 = vld [vmem:[%s2309_s22 + $0x20] sm:$0xff]  ;;  %v351_v9 = vld [vmem:[%s2309_s22 + $0x28] sm:$0xff] }
  0x6a   : > { %v357_v6 = vld [vmem:[%s2309_s22 + $0x58] sm:$0xff]  ;;  %v358_v8 = vld [vmem:[%s2309_s22 + $0x60] sm:$0xff]  ;;  %v359_v10 = vld [vmem:[%s2309_s22 + $0x68] sm:$0xff]  ;;  %vm603_vm2 = vcmp.lt.s32.totalorder %v2442_v19, 700  ;;  %vm604_vm3 = vcmp.lt.s32.totalorder %v2444_v20, 700 }
  0x6b   : > { %1756 = vmatpush1.bf16.msra.mxu0 %v1755_v46  ;;  %1777 = vmatpush1.bf16.msra.mxu1 %v1755_v46  ;;  %v352_v11 = vld [vmem:[%s2309_s22 + $0x30] sm:$0xff]  ;;  %v353_v13 = vld [vmem:[%s2309_s22 + $0x38] sm:$0xff]  ;;  %v2706_v20 = vld [vmem:[#allocation2] sm:$0xff] }
  0x6c   : > { %1758 = vmatprep.subr.bf16.mxu0 %v1757_v47  ;;  %1772 = vmatprep.subr.bf16.mxu1 %v1757_v47  ;;  %v360_v12 = vld [vmem:[%s2309_s22 + $0x70] sm:$0xff]  ;;  %v361_v14 = vld [vmem:[%s2309_s22 + $0x78] sm:$0xff] }
  0x6f   : > { %1760 = vmatpush1.bf16.msra.mxu0 %v1759_v52  ;;  %1778 = vmatpush1.bf16.msra.mxu1 %v1759_v52 }
  0x70   : > { %1762 = vmatprep.subr.bf16.mxu0 %v1761_v53  ;;  %1773 = vmatprep.subr.bf16.mxu1 %v1761_v53 }
  0x73   : > { %1764 = vmatpush1.bf16.msra.mxu0 %v1763_v58  ;;  %1779 = vmatpush1.bf16.msra.mxu1 %v1763_v58 }
  0x74   : > { %1766 = vmatprep.subr.bf16.mxu0 %v1765_v59  ;;  %1774 = vmatprep.subr.bf16.mxu1 %v1765_v59 }
  0x77   : > { %1768 = vmatpush1.bf16.msra.mxu0 %v1767_v62  ;;  %1780 = vmatpush1.bf16.msra.mxu1 %v1767_v62 }
  0x7a   : > { %1720 = vmatmul.mubr.msk.f32.vlgmr.msra.gmra.mrb[0].mxu0 %vm386_vm1, %v346_v63  ;;  %1728 = vmatmul.mubr.msk.f32.vlgmr.msra.gmra.mrb[0].mxu1 %vm386_vm1, %v354_v0 }
  0x7b   : > { %505 = vmatprep.mubr.f32.mxu0 %v2123_v33  ;;  %553 = vmatprep.mubr.f32.mxu1 %v2123_v33 }
  0x7e   : > { %1721 = vmatmul.mubr.msk.f32.gmra.mrb[2].mxu0 %vm386_vm1, %v347_v1  ;;  %1729 = vmatmul.mubr.msk.f32.gmra.mrb[2].mxu1 %vm386_vm1, %v355_v2 }
  0x7f   : > { %511 = vmatprep.mubr.f32.mxu0 %v2123_v33  ;;  %559 = vmatprep.mubr.f32.mxu1 %v2123_v33 }
  0x82   : > { %1722 = vmatmul.mubr.msk.f32.gmra.mrb[4].mxu0 %vm386_vm1, %v348_v3  ;;  %1730 = vmatmul.mubr.msk.f32.gmra.mrb[4].mxu1 %vm386_vm1, %v356_v4 }
  0x83   : > { %517 = vmatprep.mubr.f32.mxu0 %v2123_v33  ;;  %565 = vmatprep.mubr.f32.mxu1 %v2123_v33 }
  0x86   : > { %1723 = vmatmul.mubr.msk.f32.gmra.mrb[6].mxu0 %vm386_vm1, %v349_v5  ;;  %1731 = vmatmul.mubr.msk.f32.gmra.mrb[6].mxu1 %vm386_vm1, %v357_v6 }
  0x87   : > { %523 = vmatprep.mubr.f32.mxu0 %v2123_v33  ;;  %571 = vmatprep.mubr.f32.mxu1 %v2123_v33 }
  0x8a   : > { %1724 = vmatmul.mubr.msk.f32.gmra.mrb[8].mxu0 %vm386_vm1, %v350_v7  ;;  %1732 = vmatmul.mubr.msk.f32.gmra.mrb[8].mxu1 %vm386_vm1, %v358_v8 }
  0x8b   : > { %529 = vmatprep.mubr.f32.mxu0 %v2123_v33  ;;  %577 = vmatprep.mubr.f32.mxu1 %v2123_v33 }
  0x8e   : > { %1725 = vmatmul.mubr.msk.f32.gmra.mrb[10].mxu0 %vm386_vm1, %v351_v9  ;;  %1733 = vmatmul.mubr.msk.f32.gmra.mrb[10].mxu1 %vm386_vm1, %v359_v10 }
  0x8f   : > { %535 = vmatprep.mubr.f32.mxu0 %v2123_v33  ;;  %583 = vmatprep.mubr.f32.mxu1 %v2123_v33 }
  0x92   : > { %1726 = vmatmul.mubr.msk.f32.gmra.mrb[12].mxu0 %vm386_vm1, %v352_v11  ;;  %1734 = vmatmul.mubr.msk.f32.gmra.mrb[12].mxu1 %vm386_vm1, %v360_v12 }
  0x93   : > { %541 = vmatprep.mubr.f32.mxu0 %v2123_v33  ;;  %589 = vmatprep.mubr.f32.mxu1 %v2123_v33 }
  0x96   : > { %1727 = vmatmul.mubr.msk.f32.gmra.mrb[14].mxu0 %vm386_vm1, %v353_v13  ;;  %1735 = vmatmul.mubr.msk.f32.gmra.mrb[14].mxu1 %vm386_vm1, %v361_v14 }
 0x14d   : > { %v501_v21 = vpop.f32.mrb[0].mxu0  ;;  %v549_v22 = vpop.f32.mrb[0].mxu1 }
 0x14e   : > { %v641_v23 = vsel %vm603_vm2, %v501_v21, 0.0  ;;  %v503_v24 = vpop.f32.mrb[1].mxu0  ;;  %v2452_v25 = vsel %vm603_vm2, %v549_v22, -1e+30  ;;  %v657_v26 = vsel %vm603_vm2, %v549_v22, 0.0  ;;  %v551_v27 = vpop.f32.mrb[1].mxu1 }
 0x14f   : > { %v642_v28 = vsel %vm604_vm3, %v503_v24, 0.0  ;;  %v2460_v29 = vsel %vm604_vm3, %v551_v27, -1e+30  ;;  %v658_v30 = vsel %vm604_vm3, %v551_v27, 0.0  ;;  %v2466_v31 = vsel %vm603_vm2, %v501_v21, -1e+30 }
 0x150   : > { %v2470_v32 = vsel %vm604_vm3, %v503_v24, -1e+30  ;;  %v2472_v33 = vadd.f32 %v642_v28, %v641_v23  ;;  %v2474_v34 = vadd.f32 %v658_v30, %v657_v26  ;;  %v697_v42 = vmax.f32 %v2452_v25, %v2460_v29 }
 0x151   : > { %v555_v35 = vpop.f32.mrb[2].mxu1  ;;  %v673_v36 = vmax.f32 %v2466_v31, %v2470_v32  ;;  %v507_v37 = vpop.f32.mrb[2].mxu0 }
 0x152   : > { %v659_v38 = vsel %vm603_vm2, %v555_v35, 0.0  ;;  %v557_v39 = vpop.f32.mrb[3].mxu1  ;;  %v643_v40 = vsel %vm603_vm2, %v507_v37, 0.0  ;;  %v509_v41 = vpop.f32.mrb[3].mxu0  ;;  %v2488_v44 = vsel %vm603_vm2, %v507_v37, -1e+30 }
 0x153   : > { %v660_v43 = vsel %vm604_vm3, %v557_v39, 0.0  ;;  %674 = vmax.xlane.f32.xlu0 %v673_v36  ;;  %v644_v45 = vsel %vm604_vm3, %v509_v41, 0.0  ;;  %v2494_v46 = vsel %vm603_vm2, %v555_v35, -1e+30  ;;  %v2498_v47 = vsel %vm604_vm3, %v509_v41, -1e+30 }
 0x154   : > { %v2502_v48 = vsel %vm604_vm3, %v557_v39, -1e+30  ;;  %v2504_v49 = vadd.f32 %v644_v45, %v643_v40  ;;  %v2506_v50 = vadd.f32 %v660_v43, %v659_v38  ;;  %v676_v62 = vmax.f32 %v2488_v44, %v2498_v47 }
 0x155   : > { %v513_v51 = vpop.f32.mrb[4].mxu0  ;;  %v700_v52 = vmax.f32 %v2494_v46, %v2502_v48  ;;  %v561_v53 = vpop.f32.mrb[4].mxu1 }
 0x156   : > { %v2512_v54 = vsel %vm603_vm2, %v513_v51, -1e+30  ;;  %v645_v55 = vsel %vm603_vm2, %v513_v51, 0.0  ;;  %v515_v56 = vpop.f32.mrb[5].mxu0  ;;  %v2518_v57 = vsel %vm603_vm2, %v561_v53, -1e+30 }
 0x157   : > { %701 = vmax.xlane.f32.xlu1 %v700_v52  ;;  %698 = vmax.xlane.f32.xlu0 %v697_v42  ;;  %v2522_v58 = vsel %vm604_vm3, %v515_v56, -1e+30  ;;  %v646_v59 = vsel %vm604_vm3, %v515_v56, 0.0  ;;  %v661_v60 = vsel %vm603_vm2, %v561_v53, 0.0  ;;  %v563_v61 = vpop.f32.mrb[5].mxu1 }
 0x158   : > { %v2532_v63 = vsel %vm604_vm3, %v563_v61, -1e+30  ;;  %v662_v0 = vsel %vm604_vm3, %v563_v61, 0.0  ;;  %v679_v1 = vmax.f32 %v2512_v54, %v2522_v58  ;;  %v2538_v2 = vadd.f32 %v646_v59, %v645_v55 }
 0x159   : > { %v519_v3 = vpop.f32.mrb[6].mxu0  ;;  %v567_v4 = vpop.f32.mrb[6].mxu1  ;;  %v2540_v5 = vadd.f32 %v662_v0, %v661_v60  ;;  %v703_v14 = vmax.f32 %v2518_v57, %v2532_v63  ;;  %v2124_v59 = vmov 0  }
 0x15a   : > { %v2544_v6 = vsel %vm603_vm2, %v519_v3, -1e+30  ;;  %v647_v7 = vsel %vm603_vm2, %v519_v3, 0.0  ;;  %v521_v8 = vpop.f32.mrb[7].mxu0  ;;  %v2550_v9 = vsel %vm603_vm2, %v567_v4, -1e+30  ;;  %1878 = vset.pattern.permute.xlu0 %v2124_v59  ;;  %1877 = vset.pattern.permute.xlu1 %v2124_v59 }
 0x15b   : > { %677 = vmax.xlane.f32.xlu0 %v676_v62  ;;  %680 = vmax.xlane.f32.xlu1 %v679_v1  ;;  %v2554_v10 = vsel %vm604_vm3, %v521_v8, -1e+30  ;;  %v648_v11 = vsel %vm604_vm3, %v521_v8, 0.0  ;;  %v663_v12 = vsel %vm603_vm2, %v567_v4, 0.0  ;;  %v569_v13 = vpop.f32.mrb[7].mxu1 }
 0x15c   : > { %v2564_v15 = vsel %vm604_vm3, %v569_v13, -1e+30  ;;  %v664_v16 = vsel %vm604_vm3, %v569_v13, 0.0  ;;  %v682_v17 = vmax.f32 %v2544_v6, %v2554_v10  ;;  %v2570_v18 = vadd.f32 %v648_v11, %v647_v7 }
 0x15d   : > { %v525_v21 = vpop.f32.mrb[8].mxu0  ;;  %v573_v22 = vpop.f32.mrb[8].mxu1  ;;  %v2572_v23 = vadd.f32 %v664_v16, %v663_v12  ;;  %v706_v38 = vmax.f32 %v2550_v9, %v2564_v15 }
 0x15e   : > { %v2576_v24 = vsel %vm603_vm2, %v525_v21, -1e+30  ;;  %v649_v26 = vsel %vm603_vm2, %v525_v21, 0.0  ;;  %v527_v27 = vpop.f32.mrb[9].mxu0  ;;  %v2582_v28 = vsel %vm603_vm2, %v573_v22, -1e+30 }
 0x15f   : > { %704 = vmax.xlane.f32.xlu0 %v703_v14  ;;  %683 = vmax.xlane.f32.xlu1 %v682_v17  ;;  %v2586_v30 = vsel %vm604_vm3, %v527_v27, -1e+30  ;;  %v650_v35 = vsel %vm604_vm3, %v527_v27, 0.0  ;;  %v665_v36 = vsel %vm603_vm2, %v573_v22, 0.0  ;;  %v575_v37 = vpop.f32.mrb[9].mxu1 }
 0x160   : > { %v2596_v39 = vsel %vm604_vm3, %v575_v37, -1e+30  ;;  %v666_v40 = vsel %vm604_vm3, %v575_v37, 0.0  ;;  %v685_v41 = vmax.f32 %v2576_v24, %v2586_v30  ;;  %v2602_v42 = vadd.f32 %v650_v35, %v649_v26 }
 0x161   : > { %v531_v43 = vpop.f32.mrb[10].mxu0  ;;  %v579_v45 = vpop.f32.mrb[10].mxu1  ;;  %v2604_v51 = vadd.f32 %v666_v40, %v665_v36  ;;  %v709_v1 = vmax.f32 %v2582_v28, %v2596_v39 }
 0x162   : > { %v2608_v52 = vsel %vm603_vm2, %v531_v43, -1e+30  ;;  %v651_v53 = vsel %vm603_vm2, %v531_v43, 0.0  ;;  %v533_v55 = vpop.f32.mrb[11].mxu0  ;;  %v2614_v56 = vsel %vm603_vm2, %v579_v45, -1e+30 }
 0x163   : > { %707 = vmax.xlane.f32.xlu1 %v706_v38  ;;  %686 = vmax.xlane.f32.xlu0 %v685_v41  ;;  %v2618_v60 = vsel %vm604_vm3, %v533_v55, -1e+30  ;;  %v652_v61 = vsel %vm604_vm3, %v533_v55, 0.0  ;;  %v667_v62 = vsel %vm603_vm2, %v579_v45, 0.0  ;;  %v581_v0 = vpop.f32.mrb[11].mxu1 }
 0x164   : > { %v2628_v3 = vsel %vm604_vm3, %v581_v0, -1e+30  ;;  %v668_v4 = vsel %vm604_vm3, %v581_v0, 0.0  ;;  %v688_v7 = vmax.f32 %v2608_v52, %v2618_v60  ;;  %v2634_v8 = vadd.f32 %v652_v61, %v651_v53 }
 0x165   : > { %v537_v11 = vpop.f32.mrb[12].mxu0  ;;  %v585_v12 = vpop.f32.mrb[12].mxu1  ;;  %v2636_v13 = vadd.f32 %v668_v4, %v667_v62  ;;  %v712_v36 = vmax.f32 %v2614_v56, %v2628_v3 }
 0x166   : > { %v2640_v14 = vsel %vm603_vm2, %v537_v11, -1e+30  ;;  %v653_v16 = vsel %vm603_vm2, %v537_v11, 0.0  ;;  %v539_v17 = vpop.f32.mrb[13].mxu0  ;;  %v2646_v21 = vsel %vm603_vm2, %v585_v12, -1e+30 }
 0x167   : > { %710 = vmax.xlane.f32.xlu0 %v709_v1  ;;  %689 = vmax.xlane.f32.xlu1 %v688_v7  ;;  %v2650_v22 = vsel %vm604_vm3, %v539_v17, -1e+30  ;;  %v654_v26 = vsel %vm604_vm3, %v539_v17, 0.0  ;;  %v669_v27 = vsel %vm603_vm2, %v585_v12, 0.0  ;;  %v587_v35 = vpop.f32.mrb[13].mxu1 }
 0x168   : > { %v2660_v37 = vsel %vm604_vm3, %v587_v35, -1e+30  ;;  %v670_v38 = vsel %vm604_vm3, %v587_v35, 0.0  ;;  %v691_v40 = vmax.f32 %v2640_v14, %v2650_v22  ;;  %v1124_v41 = vadd.f32 %v654_v26, %v653_v16 }
 0x169   : > { %v543_v43 = vpop.f32.mrb[14].mxu0  ;;  %v591_v45 = vpop.f32.mrb[14].mxu1  ;;  %v2666_v53 = vadd.f32 %v670_v38, %v669_v27  ;;  %v715_v11 = vmax.f32 %v2646_v21, %v2660_v37  ;;  %v2711_v38 = vld [vmem:[#allocation2 + $0x48] sm:$0xff] }
 0x16a   : > { %v2670_v55 = vsel %vm603_vm2, %v543_v43, -1e+30  ;;  %v655_v59 = vsel %vm603_vm2, %v543_v43, 0.0  ;;  %v545_v61 = vpop.f32.mrb[15].mxu0  ;;  %v2676_v62 = vsel %vm603_vm2, %v591_v45, -1e+30 }
 0x16b   : > { %713 = vmax.xlane.f32.xlu1 %v712_v36  ;;  %692 = vmax.xlane.f32.xlu0 %v691_v40  ;;  %v2680_v0 = vsel %vm604_vm3, %v545_v61, -1e+30  ;;  %v656_v1 = vsel %vm604_vm3, %v545_v61, 0.0  ;;  %v671_v4 = vsel %vm603_vm2, %v591_v45, 0.0  ;;  %v593_v7 = vpop.f32.mrb[15].mxu1  ;;  %v2713_v40 = vld [vmem:[#allocation2 + $0x40] sm:$0xff] }
 0x16c   : > { %v2690_v12 = vsel %vm604_vm3, %v593_v7, -1e+30  ;;  %v672_v16 = vsel %vm604_vm3, %v593_v7, 0.0  ;;  %v694_v17 = vmax.f32 %v2670_v55, %v2680_v0  ;;  %v2696_v26 = vadd.f32 %v656_v1, %v655_v59  ;;  %v2726_v43 = vld [vmem:[#allocation2 + $0x8] sm:$0xff]  ;;  %v2728_v45 = vld [vmem:[#allocation2 + $0x10] sm:$0xff]  ;;  %v2767_v61 = vld [vmem:[#allocation2 + $0x20] sm:$0xff] }
 0x16d   : > { %v2698_v27 = vadd.f32 %v672_v16, %v671_v4  ;;  %v718_v19 = vmax.f32 %v2676_v62, %v2690_v12  ;;  %3191 = vst [vmem:[#allocation11_spill] sm:$0xff] %v2726_v43  ;;  %3192 = vst [vmem:[#allocation12_spill] sm:$0xff] %v2728_v45  ;;  %v2746_v16 = vld [vmem:[#allocation2 + $0x50] sm:$0xff] }
 0x16e   : > { %3195 = vst [vmem:[#allocation15_spill] sm:$0xff] %v2746_v16  ;;  %3200 = vst [vmem:[#allocation20_spill] sm:$0xff] %v2767_v61 }
 0x16f   : > { %716 = vmax.xlane.f32.xlu0 %v715_v11  ;;  %695 = vmax.xlane.f32.xlu1 %v694_v17  ;;  %v2748_v17 = vld [vmem:[#allocation2 + $0x18] sm:$0xff] }
 0x170   : > { %3196 = vst [vmem:[#allocation16_spill] sm:$0xff] %v2748_v17 }
 0x173   : > { %1107 = vadd.xlane.f32.xlu0 %v2472_v33  ;;  %719 = vmax.xlane.f32.xlu1 %v718_v19  ;;  %v2765_v19 = vld [vmem:[#allocation2 + $0x58] sm:$0xff] }
 0x174   : > { %3199 = vst [vmem:[#allocation19_spill] sm:$0xff] %v2765_v19 }
 0x177   : > { %1113 = vadd.xlane.f32.xlu0 %v2538_v2 }
 0x17b   : > { %1119 = vadd.xlane.f32.xlu0 %v2602_v42 }
 0x17f   : > { %1125 = vadd.xlane.f32.xlu0 %v1124_v41 }
 0x183   : > { %1131 = vadd.xlane.f32.xlu0 %v2474_v34 }
 0x1e0   : > { %v675_v35 = vpop.xlane.xlu0 %674 }
 0x1e1   : > { %v2709_v36 = vmax.f32 %v2706_v20, %v675_v35  ;;  %v2784_v35 = vld [vmem:[#allocation2 + $0x60] sm:$0xff] }
 0x1e2   : > { %3203 = vst [vmem:[#allocation23_spill] sm:$0xff] %v2784_v35 }
 0x1e3   : > { %1186 = vst.msk [vmem:[#allocation2] sm:$0xff] %vm1073_vm4, %v2709_v36  ;;  %835 = vperm.xlu0 %1878, %v2709_v36  }
 0x1e4   : > { %v702_v34 = vpop.xlane.xlu1 %701  ;;  %v699_v2 = vpop.xlane.xlu0 %698 }
 0x1e5   : > { %v2721_v42 = vmax.f32 %v2711_v38, %v702_v34  ;;  %v2724_v41 = vmax.f32 %v2713_v40, %v699_v2 }
 0x1e7   : > { %3190 = vst [vmem:[#allocation10_spill] sm:$0xff] %v2724_v41  ;;  %1195 = vst.msk [vmem:[#allocation2 + $0x48] sm:$0xff] %vm1073_vm4, %v2721_v42  ;;  %880 = vperm.xlu0 %1878, %v2721_v42   ;;  %875 = vperm.xlu1 %1877, %v2724_v41  }
 0x1e8   : > { %1194 = vst.msk [vmem:[#allocation2 + $0x40] sm:$0xff] %vm1073_vm4, %v2724_v41  ;;  %v678_v1 = vpop.xlane.xlu0 %677  ;;  %v681_v4 = vpop.xlane.xlu1 %680  ;;  %v1092_v41 = vld [vmem:[#allocation4 + $0x10] sm:$0xff] }
 0x1e9   : > { %v2741_v7 = vmax.f32 %v2726_v43, %v678_v1  ;;  %v2744_v11 = vmax.f32 %v2728_v45, %v681_v4  ;;  %v2843_v43 = vld [vmem:[#allocation2 + $0x78] sm:$0xff] }
 0x1ea   : > { %3210 = vst [vmem:[#allocation30_spill] sm:$0xff] %v2843_v43 }
 0x1eb   : > { %3193 = vst [vmem:[#allocation13_spill] sm:$0xff] %v2741_v7  ;;  %3194 = vst [vmem:[#allocation14_spill] sm:$0xff] %v2744_v11  ;;  %840 = vperm.xlu1 %1877, %v2741_v7  }
 0x1ec   : > { %1187 = vst.msk [vmem:[#allocation2 + $0x8] sm:$0xff] %vm1073_vm4, %v2741_v7  ;;  %1188 = vst.msk [vmem:[#allocation2 + $0x10] sm:$0xff] %vm1073_vm4, %v2744_v11  ;;  %v705_v34 = vpop.xlane.xlu0 %704  ;;  %v684_v2 = vpop.xlane.xlu1 %683  ;;  %v2806_v7 = vld [vmem:[#allocation2 + $0x30] sm:$0xff] }
 0x1ed   : > { %v2760_v1 = vmax.f32 %v2746_v16, %v705_v34  ;;  %v2763_v4 = vmax.f32 %v2748_v17, %v684_v2  ;;  %v2786_v16 = vld [vmem:[#allocation2 + $0x28] sm:$0xff]  ;;  %3206 = vst [vmem:[#allocation26_spill] sm:$0xff] %v2806_v7  ;;  %v2823_v17 = vld [vmem:[#allocation2 + $0x70] sm:$0xff] }
 0x1ee   : > { %3204 = vst [vmem:[#allocation24_spill] sm:$0xff] %v2786_v16  ;;  %3208 = vst [vmem:[#allocation28_spill] sm:$0xff] %v2823_v17 }
 0x1ef   : > { %3197 = vst [vmem:[#allocation17_spill] sm:$0xff] %v2760_v1  ;;  %3198 = vst [vmem:[#allocation18_spill] sm:$0xff] %v2763_v4  ;;  %845 = vperm.xlu1 %1877, %v2744_v11  }
 0x1f0   : > { %1196 = vst.msk [vmem:[#allocation2 + $0x50] sm:$0xff] %vm1073_vm4, %v2760_v1  ;;  %1189 = vst.msk [vmem:[#allocation2 + $0x18] sm:$0xff] %vm1073_vm4, %v2763_v4  ;;  %v708_v34 = vpop.xlane.xlu1 %707  ;;  %v687_v2 = vpop.xlane.xlu0 %686 }
 0x1f1   : > { %v2779_v33 = vmax.f32 %v2765_v19, %v708_v34  ;;  %v2782_v45 = vmax.f32 %v2767_v61, %v687_v2  ;;  %v2804_v19 = vld [vmem:[#allocation2 + $0x68] sm:$0xff] }
 0x1f2   : > { %3205 = vst [vmem:[#allocation25_spill] sm:$0xff] %v2804_v19 }
 0x1f3   : > { %3201 = vst [vmem:[#allocation21_spill] sm:$0xff] %v2779_v33  ;;  %3202 = vst [vmem:[#allocation22_spill] sm:$0xff] %v2782_v45  ;;  %890 = vperm.xlu0 %1878, %v2779_v33   ;;  %885 = vperm.xlu1 %1877, %v2760_v1  }
 0x1f4   : > { %1197 = vst.msk [vmem:[#allocation2 + $0x58] sm:$0xff] %vm1073_vm4, %v2779_v33  ;;  %1190 = vst.msk [vmem:[#allocation2 + $0x20] sm:$0xff] %vm1073_vm4, %v2782_v45  ;;  %v711_v34 = vpop.xlane.xlu0 %710  ;;  %v690_v2 = vpop.xlane.xlu1 %689 }
 0x1f5   : > { %v2799_v11 = vmax.f32 %v2784_v35, %v711_v34  ;;  %v2802_v59 = vmax.f32 %v2786_v16, %v690_v2  ;;  %v2825_v35 = vld [vmem:[#allocation2 + $0x38] sm:$0xff] }
 0x1f6   : > { %3209 = vst [vmem:[#allocation29_spill] sm:$0xff] %v2825_v35 }
 0x1f7   : > { %1198 = vst.msk [vmem:[#allocation2 + $0x60] sm:$0xff] %vm1073_vm4, %v2799_v11  ;;  %1191 = vst.msk [vmem:[#allocation2 + $0x28] sm:$0xff] %vm1073_vm4, %v2802_v59  ;;  %850 = vperm.xlu1 %1877, %v2763_v4  }
 0x1f8   : > { %v714_v34 = vpop.xlane.xlu1 %713  ;;  %v693_v2 = vpop.xlane.xlu0 %692 }
 0x1f9   : > { %v2818_v33 = vmax.f32 %v2804_v19, %v714_v34  ;;  %v2821_v1 = vmax.f32 %v2806_v7, %v693_v2  ;;  %v1090_v19 = vld [vmem:[#allocation4] sm:$0xff] }
 0x1fb   : > { %3207 = vst [vmem:[#allocation27_spill] sm:$0xff] %v2818_v33  ;;  %1199 = vst.msk [vmem:[#allocation2 + $0x68] sm:$0xff] %vm1073_vm4, %v2818_v33  ;;  %900 = vperm.xlu0 %1878, %v2818_v33   ;;  %855 = vperm.xlu1 %1877, %v2782_v45  }
 0x1fc   : > { %1192 = vst.msk [vmem:[#allocation2 + $0x30] sm:$0xff] %vm1073_vm4, %v2821_v1  ;;  %v717_v34 = vpop.xlane.xlu0 %716  ;;  %v696_v2 = vpop.xlane.xlu1 %695 }
 0x1fd   : > { %v2838_v4 = vmax.f32 %v2823_v17, %v717_v34  ;;  %v2841_v61 = vmax.f32 %v2825_v35, %v696_v2  ;;  %v1094_v35 = vld [vmem:[#allocation4 + $0x20] sm:$0xff] }
 0x1ff   : > { %1200 = vst.msk [vmem:[#allocation2 + $0x70] sm:$0xff] %vm1073_vm4, %v2838_v4  ;;  %1193 = vst.msk [vmem:[#allocation2 + $0x38] sm:$0xff] %vm1073_vm4, %v2841_v61  ;;  %895 = vperm.xlu1 %1877, %v2799_v11  }
 0x200   : > { %v1108_v34 = vpop.xlane.xlu0 %1107  ;;  %v720_v2 = vpop.xlane.xlu1 %719 }
 0x201   : > { %v1154_v7 = vadd.f32 %v1108_v34, %v1090_v19  ;;  %v2855_v45 = vmax.f32 %v2843_v43, %v720_v2  ;;  %v1098_v43 = vld [vmem:[#allocation4 + $0x40] sm:$0xff] }
 0x203   : > { %1170 = vst.msk [vmem:[#allocation4] sm:$0xff] %vm1073_vm4, %v1154_v7  ;;  %1201 = vst.msk [vmem:[#allocation2 + $0x78] sm:$0xff] %vm1073_vm4, %v2855_v45  ;;  %860 = vperm.xlu1 %1877, %v2802_v59   ;;  %910 = vperm.xlu0 %1878, %v2855_v45   ;;  %v1096_v7 = vld [vmem:[#allocation4 + $0x30] sm:$0xff] }
 0x204   : > { %v1114_v33 = vpop.xlane.xlu0 %1113 }
 0x205   : > { %v1156_v17 = vadd.f32 %v1114_v33, %v1092_v41 }
 0x207   : > { %1172 = vst.msk [vmem:[#allocation4 + $0x10] sm:$0xff] %vm1073_vm4, %v1156_v17  ;;  %865 = vperm.xlu1 %1877, %v2821_v1  }
 0x208   : > { %v1120_v19 = vpop.xlane.xlu0 %1119 }
 0x209   : > { %v1158_v34 = vadd.f32 %v1120_v19, %v1094_v35 }
 0x20b   : > { %1174 = vst.msk [vmem:[#allocation4 + $0x20] sm:$0xff] %vm1073_vm4, %v1158_v34  ;;  %870 = vperm.xlu1 %1877, %v2841_v61  }
 0x20c   : > { %v1126_v2 = vpop.xlane.xlu0 %1125 }
 0x20d   : > { %v1160_v16 = vadd.f32 %v1126_v2, %v1096_v7 }
 0x20f   : > { %1176 = vst.msk [vmem:[#allocation4 + $0x30] sm:$0xff] %vm1073_vm4, %v1160_v16  ;;  %905 = vperm.xlu1 %1877, %v2838_v4  }
 0x210   : > { %v1132_v33 = vpop.xlane.xlu0 %1131 }
 0x211   : > { %v1162_v41 = vadd.f32 %v1132_v33, %v1098_v43 }
 0x213   : > { %1178 = vst.msk [vmem:[#allocation4 + $0x40] sm:$0xff] %vm1073_vm4, %v1162_v41 }
 0x222   : > { %1137 = vadd.xlane.f32.xlu0 %v2540_v5 }
 0x226   : > { %1143 = vadd.xlane.f32.xlu0 %v2604_v51 }
 0x233   : > { %1110 = vadd.xlane.f32.xlu1 %v2504_v49 }
 0x237   : > { %1116 = vadd.xlane.f32.xlu1 %v2570_v18 }
 0x23b   : > { %1122 = vadd.xlane.f32.xlu1 %v2634_v8 }
 0x23f   : > { %1128 = vadd.xlane.f32.xlu1 %v2696_v26 }
 0x243   : > { %1134 = vadd.xlane.f32.xlu1 %v2506_v50 }
 0x247   : > { %1140 = vadd.xlane.f32.xlu1 %v2572_v23 }
 0x24b   : > { %1146 = vadd.xlane.f32.xlu1 %v2636_v13 }
 0x262   : > { %v836_v43 = vpop.permute.xlu0 %835 }
 0x263   : > { %v913_v16 = vsub.f32 %v2466_v31, %v836_v43  ;;  %v914_v5 = vsub.f32 %v2470_v32, %v836_v43 }
 0x265   : > { %v945_v51 = vmul.f32 1.442695, %v913_v16  ;;  %v947_v17 = vmul.f32 1.442695, %v914_v5 }
 0x266   : > { %v881_v49 = vpop.permute.xlu0 %880  ;;  %v876_v35 = vpop.permute.xlu1 %875 }
 0x267   : > { %1879 = vpow2.f32 %v945_v51  ;;  %v931_v18 = vsub.f32 %v2494_v46, %v881_v49  ;;  %v932_v8 = vsub.f32 %v2502_v48, %v881_v49  ;;  %v929_v50 = vsub.f32 %v2452_v25, %v876_v35 }
 0x268   : > { %1881 = vpow2.f32 %v947_v17  ;;  %v930_v23 = vsub.f32 %v2460_v29, %v876_v35 }
 0x269   : > { %v981_v13 = vmul.f32 1.442695, %v931_v18  ;;  %v983_v26 = vmul.f32 1.442695, %v932_v8  ;;  %v977_v19 = vmul.f32 1.442695, %v929_v50 }
 0x26a   : > { %v979_v31 = vmul.f32 1.442695, %v930_v23  ;;  %v841_v34 = vpop.permute.xlu1 %840 }
 0x26b   : > { %1883 = vpow2.f32 %v981_v13  ;;  %v915_v32 = vsub.f32 %v2488_v44, %v841_v34  ;;  %v916_v7 = vsub.f32 %v2498_v47, %v841_v34 }
 0x26c   : > { %1885 = vpow2.f32 %v983_v26 }
 0x26d   : > { %1887 = vpow2.f32 %v977_v19  ;;  %v949_v46 = vmul.f32 1.442695, %v915_v32  ;;  %v951_v2 = vmul.f32 1.442695, %v916_v7 }
 0x26e   : > { %1889 = vpow2.f32 %v979_v31  ;;  %v846_v48 = vpop.permute.xlu1 %845 }
 0x26f   : > { %1891 = vpow2.f32 %v949_v46  ;;  %v917_v25 = vsub.f32 %v2512_v54, %v846_v48  ;;  %v918_v29 = vsub.f32 %v2522_v58, %v846_v48 }
 0x270   : > { %1893 = vpow2.f32 %v951_v2 }
 0x271   : > { %v1880_v33 = vpop.eup %1879  ;;  %v953_v41 = vmul.f32 1.442695, %v917_v25  ;;  %v955_v43 = vmul.f32 1.442695, %v918_v29 }
 0x272   : > { %v1882_v16 = vpop.eup %1881  ;;  %v891_v5 = vpop.permute.xlu0 %890 }
 0x273   : > { %v886_v44 = vpop.permute.xlu1 %885  ;;  %1895 = vpow2.f32 %v953_v41  ;;  %v935_v51 = vsub.f32 %v2550_v9, %v891_v5  ;;  %v1009_v49 = vadd.f32 %v1882_v16, %v1880_v33  ;;  %v936_v58 = vsub.f32 %v2564_v15, %v891_v5 }
 0x274   : > { %v933_v47 = vsub.f32 %v2518_v57, %v886_v44  ;;  %1897 = vpow2.f32 %v955_v43  ;;  %v934_v17 = vsub.f32 %v2532_v63, %v886_v44 }
 0x275   : > { %v1884_v35 = vpop.eup %1883  ;;  %1010 = vadd.xlane.f32.xlu1 %v1009_v49  ;;  %v989_v31 = vmul.f32 1.442695, %v935_v51  ;;  %v991_v46 = vmul.f32 1.442695, %v936_v58 }
 0x276   : > { %v985_v54 = vmul.f32 1.442695, %v933_v47  ;;  %v1886_v18 = vpop.eup %1885  ;;  %v987_v8 = vmul.f32 1.442695, %v934_v17 }
 0x277   : > { %v851_v50 = vpop.permute.xlu1 %850  ;;  %v1888_v23 = vpop.eup %1887  ;;  %v1036_v57 = vadd.f32 %v1886_v18, %v1884_v35 }
 0x278   : > { %v919_v13 = vsub.f32 %v2544_v6, %v851_v50  ;;  %v920_v26 = vsub.f32 %v2554_v10, %v851_v50  ;;  %v1890_v19 = vpop.eup %1889  ;;  %1899 = vpow2.f32 %v985_v54 }
 0x279   : > { %v1892_v9 = vpop.eup %1891  ;;  %v1033_v32 = vadd.f32 %v1890_v19, %v1888_v23  ;;  %1901 = vpow2.f32 %v987_v8  ;;  %1037 = vadd.xlane.f32.xlu1 %v1036_v57 }
 0x27a   : > { %v957_v63 = vmul.f32 1.442695, %v919_v13  ;;  %v959_v34 = vmul.f32 1.442695, %v920_v26  ;;  %v1894_v7 = vpop.eup %1893  ;;  %v901_v6 = vpop.permute.xlu0 %900 }
 0x27b   : > { %v856_v15 = vpop.permute.xlu1 %855  ;;  %1034 = vadd.xlane.f32.xlu0 %v1033_v32  ;;  %v1012_v48 = vadd.f32 %v1894_v7, %v1892_v9  ;;  %v939_v16 = vsub.f32 %v2614_v56, %v901_v6  ;;  %v940_v47 = vsub.f32 %v2628_v3, %v901_v6 }
 0x27c   : > { %1903 = vpow2.f32 %v957_v63  ;;  %v921_v2 = vsub.f32 %v2576_v24, %v856_v15  ;;  %v922_v10 = vsub.f32 %v2586_v30, %v856_v15 }
 0x27d   : > { %1905 = vpow2.f32 %v959_v34  ;;  %v1896_v25 = vpop.eup %1895  ;;  %v997_v35 = vmul.f32 1.442695, %v939_v16  ;;  %v999_v18 = vmul.f32 1.442695, %v940_v47 }
 0x27e   : > { %1907 = vpow2.f32 %v989_v31  ;;  %v961_v29 = vmul.f32 1.442695, %v921_v2  ;;  %v1898_v33 = vpop.eup %1897  ;;  %v963_v41 = vmul.f32 1.442695, %v922_v10 }
 0x27f   : > { %1909 = vpow2.f32 %v991_v46  ;;  %v896_v43 = vpop.permute.xlu1 %895  ;;  %1013 = vadd.xlane.f32.xlu0 %v1012_v48  ;;  %v1015_v24 = vadd.f32 %v1898_v33, %v1896_v25 }
 0x280   : > { %v937_v5 = vsub.f32 %v2582_v28, %v896_v43  ;;  %v938_v44 = vsub.f32 %v2596_v39, %v896_v43  ;;  %1911 = vpow2.f32 %v961_v29 }
 0x281   : > { %1913 = vpow2.f32 %v963_v41 }
 0x282   : > { %v993_v30 = vmul.f32 1.442695, %v937_v5  ;;  %v995_v51 = vmul.f32 1.442695, %v938_v44  ;;  %v1900_v49 = vpop.eup %1899  ;;  %v911_v50 = vpop.permute.xlu0 %910 }
 0x283   : > { %v861_v17 = vpop.permute.xlu1 %860  ;;  %1016 = vadd.xlane.f32.xlu0 %v1015_v24  ;;  %v1902_v56 = vpop.eup %1901  ;;  %v943_v9 = vsub.f32 %v2676_v62, %v911_v50  ;;  %v944_v34 = vsub.f32 %v2690_v12, %v911_v50 }
 0x284   : > { %1915 = vpow2.f32 %v993_v30  ;;  %v923_v54 = vsub.f32 %v2608_v52, %v861_v17  ;;  %v924_v28 = vsub.f32 %v2618_v60, %v861_v17  ;;  %v1039_v8 = vadd.f32 %v1902_v56, %v1900_v49 }
 0x285   : > { %1917 = vpow2.f32 %v995_v51  ;;  %v1005_v6 = vmul.f32 1.442695, %v943_v9  ;;  %v1007_v29 = vmul.f32 1.442695, %v944_v34  ;;  %v1097_v34 = vld [vmem:[#allocation4 + $0x38] sm:$0xff] }
 0x286   : > { %v1904_v39 = vpop.eup %1903  ;;  %v965_v58 = vmul.f32 1.442695, %v923_v54  ;;  %v967_v23 = vmul.f32 1.442695, %v924_v28  ;;  %1919 = vpow2.f32 %v997_v35 }
 0x287   : > { %v1906_v3 = vpop.eup %1905  ;;  %v866_v13 = vpop.permute.xlu1 %865  ;;  %1040 = vadd.xlane.f32.xlu0 %v1039_v8  ;;  %1921 = vpow2.f32 %v999_v18  ;;  %v1100_v8 = vld [vmem:[#allocation4 + $0x50] sm:$0xff] }
 0x288   : > { %v1908_v26 = vpop.eup %1907  ;;  %v925_v57 = vsub.f32 %v2640_v14, %v866_v13  ;;  %v926_v19 = vsub.f32 %v2650_v22, %v866_v13  ;;  %v1018_v52 = vadd.f32 %v1906_v3, %v1904_v39  ;;  %1923 = vpow2.f32 %v965_v58 }
 0x289   : > { %v1910_v31 = vpop.eup %1909  ;;  %1925 = vpow2.f32 %v967_v23  ;;  %v1102_v23 = vld [vmem:[#allocation4 + $0x60] sm:$0xff] }
 0x28a   : > { %v969_v60 = vmul.f32 1.442695, %v925_v57  ;;  %v971_v63 = vmul.f32 1.442695, %v926_v19  ;;  %1019 = vadd.xlane.f32.xlu1 %v1018_v52  ;;  %v1912_v7 = vpop.eup %1911  ;;  %v1042_v22 = vadd.f32 %v1910_v31, %v1908_v26  ;;  %v1091_v57 = vld [vmem:[#allocation4 + $0x8] sm:$0xff]  ;;  %v1093_v31 = vld [vmem:[#allocation4 + $0x18] sm:$0xff] }
 0x28b   : > { %v871_v32 = vpop.permute.xlu1 %870  ;;  %v1914_v15 = vpop.eup %1913 }
 0x28c   : > { %1927 = vpow2.f32 %v969_v60  ;;  %v927_v46 = vsub.f32 %v2670_v55, %v871_v32  ;;  %v928_v14 = vsub.f32 %v2680_v0, %v871_v32  ;;  %v1021_v48 = vadd.f32 %v1914_v15, %v1912_v7  ;;  %v1095_v60 = vld [vmem:[#allocation4 + $0x28] sm:$0xff]  ;;  %v1101_v15 = vld [vmem:[#allocation4 + $0x58] sm:$0xff] }
 0x28d   : > { %1929 = vpow2.f32 %v971_v63 }
 0x28e   : > { %v1916_v2 = vpop.eup %1915  ;;  %v973_v62 = vmul.f32 1.442695, %v927_v46  ;;  %v975_v10 = vmul.f32 1.442695, %v928_v14  ;;  %1043 = vadd.xlane.f32.xlu1 %v1042_v22  ;;  %1022 = vadd.xlane.f32.xlu0 %v1021_v48  ;;  %v1099_v46 = vld [vmem:[#allocation4 + $0x48] sm:$0xff] }
 0x28f   : > { %v1918_v25 = vpop.eup %1917  ;;  %v906_v12 = vpop.permute.xlu1 %905 }
 0x290   : > { %1931 = vpow2.f32 %v973_v62  ;;  %v941_v33 = vsub.f32 %v2646_v21, %v906_v12  ;;  %v942_v55 = vsub.f32 %v2660_v37, %v906_v12  ;;  %v1045_v41 = vadd.f32 %v1918_v25, %v1916_v2  ;;  %v1920_v0 = vpop.eup %1919  ;;  %v1103_v62 = vld [vmem:[#allocation4 + $0x68] sm:$0xff] }
 0x291   : > { %1933 = vpow2.f32 %v975_v10  ;;  %v1922_v5 = vpop.eup %1921  ;;  %v3211_v25 = vsub.f32 %v2706_v20, %v2709_v36  ;;  %v3212_v12 = vsub.f32 %v2711_v38, %v2721_v42  ;;  %v3221_v38 = vld [vmem:[#allocation15_spill] sm:$0xff]  ;;  %v3222_v42 = vld [vmem:[#allocation17_spill] sm:$0xff] }
 0x292   : > { %1935 = vpow2.f32 %v1005_v6  ;;  %v1001_v43 = vmul.f32 1.442695, %v941_v33  ;;  %v1003_v16 = vmul.f32 1.442695, %v942_v55  ;;  %v1924_v44 = vpop.eup %1923  ;;  %1046 = vadd.xlane.f32.xlu0 %v1045_v41  ;;  %v1048_v37 = vadd.f32 %v1922_v5, %v1920_v0  ;;  %v3213_v55 = vld [vmem:[#allocation10_spill] sm:$0xff] }
 0x293   : > { %1937 = vpow2.f32 %v1007_v29  ;;  %v1926_v24 = vpop.eup %1925  ;;  %v769_v29 = vmul.f32 1.442695, %v3211_v25  ;;  %v787_v33 = vmul.f32 1.442695, %v3212_v12  ;;  %v3214_v41 = vsub.f32 %v2713_v40, %v3213_v55  ;;  %v3235_v55 = vld [vmem:[#allocation24_spill] sm:$0xff] }
 0x294   : > { %1939 = vpow2.f32 %v1001_v43  ;;  %v1024_v30 = vadd.f32 %v1926_v24, %v1924_v44  ;;  %v3215_v43 = vld [vmem:[#allocation11_spill] sm:$0xff]  ;;  %v3218_v24 = vld [vmem:[#allocation12_spill] sm:$0xff] }
 0x295   : > { %1941 = vpow2.f32 %v1003_v16  ;;  %v785_v0 = vmul.f32 1.442695, %v3214_v41  ;;  %v3216_v16 = vld [vmem:[#allocation13_spill] sm:$0xff]  ;;  %v3236_v41 = vsub.f32 %v3235_v55, %v2802_v59 }
 0x296   : > { %v1928_v47 = vpop.eup %1927  ;;  %1025 = vadd.xlane.f32.xlu1 %v1024_v30  ;;  %1943 = vpow2.f32 %v769_v29  ;;  %v3217_v5 = vsub.f32 %v3215_v43, %v3216_v16  ;;  %v811_v29 = vld [vmem:[#allocation3 + $0x50] sm:$0xff]  ;;  %v804_v43 = vld [vmem:[#allocation3 + $0x18] sm:$0xff] }
 0x297   : > { %v1930_v51 = vpop.eup %1929  ;;  %1945 = vpow2.f32 %v787_v33  ;;  %v812_v59 = vld [vmem:[#allocation3 + $0x58] sm:$0xff] }
 0x298   : > { %v1027_v21 = vadd.f32 %v1930_v51, %v1928_v47  ;;  %1947 = vpow2.f32 %v785_v0  ;;  %v771_v44 = vmul.f32 1.442695, %v3217_v5  ;;  %v3219_v47 = vld [vmem:[#allocation14_spill] sm:$0xff]  ;;  %v779_v0 = vmul.f32 1.442695, %v3236_v41 }
 0x299   : > { %v3220_v20 = vsub.f32 %v3218_v24, %v3219_v47  ;;  %v801_v51 = vld [vmem:[#allocation3] sm:$0xff] }
 0x29a   : > { %v1932_v17 = vpop.eup %1931  ;;  %1028 = vadd.xlane.f32.xlu0 %v1027_v21  ;;  %1049 = vadd.xlane.f32.xlu1 %v1048_v37  ;;  %1949 = vpow2.f32 %v771_v44  ;;  %v3223_v21 = vsub.f32 %v3221_v38, %v3222_v42  ;;  %v3237_v5 = vld [vmem:[#allocation26_spill] sm:$0xff] }
 0x29b   : > { %v1934_v49 = vpop.eup %1933  ;;  %v773_v36 = vmul.f32 1.442695, %v3220_v20 }
 0x29c   : > { %v1936_v35 = vpop.eup %1935  ;;  %v1030_v54 = vadd.f32 %v1934_v49, %v1932_v17  ;;  %v789_v17 = vmul.f32 1.442695, %v3223_v21 }
 0x29d   : > { %v1938_v56 = vpop.eup %1937  ;;  %1951 = vpow2.f32 %v773_v36 }
 0x29e   : > { %v1940_v18 = vpop.eup %1939  ;;  %1031 = vadd.xlane.f32.xlu1 %v1030_v54  ;;  %v1054_v58 = vadd.f32 %v1938_v56, %v1936_v35  ;;  %v810_v35 = vld [vmem:[#allocation3 + $0x48] sm:$0xff]  ;;  %v3224_v56 = vld [vmem:[#allocation16_spill] sm:$0xff]  ;;  %1953 = vpow2.f32 %v789_v17 }
 0x29f   : > { %v1942_v28 = vpop.eup %1941 }
 0x2a0   : > { %v1051_v39 = vadd.f32 %v1942_v28, %v1940_v18  ;;  %v1944_v30 = vpop.eup %1943  ;;  %v3225_v18 = vld [vmem:[#allocation18_spill] sm:$0xff] }
 0x2a1   : > { %v817_v40 = vmul.f32 %v1944_v30, %v801_v51  ;;  %v1946_v37 = vpop.eup %1945  ;;  %v3226_v28 = vsub.f32 %v3224_v56, %v3225_v18  ;;  %v3239_v30 = vld [vmem:[#allocation25_spill] sm:$0xff]  ;;  %v3240_v51 = vld [vmem:[#allocation27_spill] sm:$0xff] }
 0x2a2   : > { %1052 = vadd.xlane.f32.xlu0 %v1051_v39  ;;  %1055 = vadd.xlane.f32.xlu1 %v1054_v58  ;;  %v1948_v54 = vpop.eup %1947  ;;  %v3241_v38 = vsub.f32 %v3239_v30, %v3240_v51  ;;  %v1208_v51 = vld [vmem:[%s2309_s22 + $0x10] sm:$0xff] (!%p1737_p5) }
 0x2a3   : > { %v775_v39 = vmul.f32 1.442695, %v3226_v28 }
 0x2a4   : > { %v795_v42 = vmul.f32 1.442695, %v3241_v38  ;;  %v1224_v38 = vld [vmem:[%s2314_s1 + $0x10] sm:$0xff] (!%p1737_p5) }
 0x2a5   : > { %1955 = vpow2.f32 %v775_v39 }
 0x2a6   : > { %1149 = vadd.xlane.f32.xlu0 %v2666_v53  ;;  %1152 = vadd.xlane.f32.xlu1 %v2698_v27 }
 0x2af   : > { %v1138_v3 = vpop.xlane.xlu0 %1137 }
 0x2b0   : > { %v1164_v50 = vadd.f32 %v1138_v3, %v1100_v8  ;;  %v809_v8 = vld [vmem:[#allocation3 + $0x40] sm:$0xff]  ;;  %v826_v3 = vmul.f32 %v1946_v37, %v810_v35 }
 0x2b1   : > { %v805_v37 = vld [vmem:[#allocation3 + $0x20] sm:$0xff] }
 0x2b2   : > { %1180 = vst.msk [vmem:[#allocation4 + $0x50] sm:$0xff] %vm1073_vm4, %v1164_v50  ;;  %v825_v50 = vmul.f32 %v1948_v54, %v809_v8 }
 0x2b3   : > { %v1144_v13 = vpop.xlane.xlu0 %1143 }
 0x2b4   : > { %v1166_v26 = vadd.f32 %v1144_v13, %v1102_v23  ;;  %v1950_v13 = vpop.eup %1949 }
 0x2b6   : > { %1182 = vst.msk [vmem:[#allocation4 + $0x60] sm:$0xff] %vm1073_vm4, %v1166_v26  ;;  %v3227_v26 = vld [vmem:[#allocation19_spill] sm:$0xff] }
 0x2c0   : > { %v1111_v19 = vpop.xlane.xlu1 %1110 }
 0x2c1   : > { %v1155_v52 = vadd.f32 %v1111_v19, %v1091_v57  ;;  %v3228_v57 = vld [vmem:[#allocation21_spill] sm:$0xff] }
 0x2c2   : > { %v3229_v19 = vsub.f32 %v3227_v26, %v3228_v57  ;;  %v3246_v26 = vld [vmem:[#allocation30_spill] sm:$0xff] }
 0x2c3   : > { %1171 = vst.msk [vmem:[#allocation4 + $0x8] sm:$0xff] %vm1073_vm4, %v1155_v52  ;;  %v3247_v57 = vsub.f32 %v3246_v26, %v2855_v45  ;;  %v1229_v26 = vld [vmem:[%s2314_s1 + $0x38] sm:$0xff] (!%p1737_p5) }
 0x2c4   : > { %v1117_v9 = vpop.xlane.xlu1 %1116  ;;  %v791_v52 = vmul.f32 1.442695, %v3229_v19 }
 0x2c5   : > { %v1157_v53 = vadd.f32 %v1117_v9, %v1093_v31  ;;  %v799_v19 = vmul.f32 1.442695, %v3247_v57 }
 0x2c6   : > { %1957 = vpow2.f32 %v791_v52 }
 0x2c7   : > { %1173 = vst.msk [vmem:[#allocation4 + $0x18] sm:$0xff] %vm1073_vm4, %v1157_v53  ;;  %v802_v53 = vld [vmem:[#allocation3 + $0x8] sm:$0xff] }
 0x2c8   : > { %v1123_v27 = vpop.xlane.xlu1 %1122 }
 0x2c9   : > { %v1159_v63 = vadd.f32 %v1123_v27, %v1095_v60  ;;  %v3230_v27 = vld [vmem:[#allocation20_spill] sm:$0xff] }
 0x2cb   : > { %1175 = vst.msk [vmem:[#allocation4 + $0x28] sm:$0xff] %vm1073_vm4, %v1159_v63  ;;  %v3231_v63 = vld [vmem:[#allocation22_spill] sm:$0xff] }
 0x2cc   : > { %v1129_v32 = vpop.xlane.xlu1 %1128 }
 0x2cd   : > { %v1161_v7 = vadd.f32 %v1129_v32, %v1097_v34  ;;  %v3232_v34 = vsub.f32 %v3230_v27, %v3231_v63 }
 0x2cf   : > { %1177 = vst.msk [vmem:[#allocation4 + $0x38] sm:$0xff] %vm1073_vm4, %v1161_v7  ;;  %v777_v32 = vmul.f32 1.442695, %v3232_v34  ;;  %v818_v7 = vmul.f32 %v1950_v13, %v802_v53 }
 0x2d0   : > { %v1135_v14 = vpop.xlane.xlu1 %1134 }
 0x2d1   : > { %v1163_v22 = vadd.f32 %v1135_v14, %v1099_v46  ;;  %v1952_v46 = vpop.eup %1951  ;;  %1959 = vpow2.f32 %v777_v32  ;;  %v814_v32 = vld [vmem:[#allocation3 + $0x68] sm:$0xff] }
 0x2d3   : > { %1179 = vst.msk [vmem:[#allocation4 + $0x48] sm:$0xff] %vm1073_vm4, %v1163_v22  ;;  %v803_v22 = vld [vmem:[#allocation3 + $0x10] sm:$0xff] }
 0x2d4   : > { %v1141_v2 = vpop.xlane.xlu1 %1140 }
 0x2d5   : > { %v1165_v6 = vadd.f32 %v1141_v2, %v1101_v15  ;;  %v3233_v2 = vld [vmem:[#allocation23_spill] sm:$0xff] }
 0x2d7   : > { %1181 = vst.msk [vmem:[#allocation4 + $0x58] sm:$0xff] %vm1073_vm4, %v1165_v6  ;;  %v3234_v6 = vsub.f32 %v3233_v2, %v2799_v11  ;;  %v3238_v11 = vsub.f32 %v3237_v5, %v2821_v1 }
 0x2d8   : > { %v1147_v10 = vpop.xlane.xlu1 %1146 }
 0x2d9   : > { %v1167_v48 = vadd.f32 %v1147_v10, %v1103_v62  ;;  %v793_v62 = vmul.f32 1.442695, %v3234_v6  ;;  %v819_v10 = vmul.f32 %v1952_v46, %v803_v22  ;;  %v781_v44 = vmul.f32 1.442695, %v3238_v11  ;;  %v808_v6 = vld [vmem:[#allocation3 + $0x38] sm:$0xff]  ;;  %v1104_v11 = vld [vmem:[#allocation4 + $0x70] sm:$0xff] }
 0x2db   : > { %1183 = vst.msk [vmem:[#allocation4 + $0x68] sm:$0xff] %vm1073_vm4, %v1167_v48  ;;  %v1954_v48 = vpop.eup %1953  ;;  %1961 = vpow2.f32 %v793_v62 }
 0x2dc   : > { %v1956_v33 = vpop.eup %1955  ;;  %v827_v16 = vmul.f32 %v1954_v48, %v811_v29  ;;  %1963 = vpow2.f32 %v779_v0  ;;  %v815_v48 = vld [vmem:[#allocation3 + $0x70] sm:$0xff] }
 0x2dd   : > { %v820_v20 = vmul.f32 %v1956_v33, %v804_v43  ;;  %v1958_v36 = vpop.eup %1957  ;;  %1965 = vpow2.f32 %v781_v44  ;;  %v816_v33 = vld [vmem:[#allocation3 + $0x78] sm:$0xff] }
 0x2de   : > { %v828_v1 = vmul.f32 %v1958_v36, %v812_v59  ;;  %1967 = vpow2.f32 %v795_v42  ;;  %v1206_v42 = vld [vmem:[%s2309_s22] sm:$0xff] (!%p1737_p5) }
 0x2df   : > { %v1222_v59 = vld [vmem:[%s2314_s1] sm:$0xff] (!%p1737_p5) }
 0x302   : > { %v1011_v49 = vpop.xlane.xlu1 %1010 }
 0x303   : > { %v1057_v58 = vadd.f32 %v1011_v49, %v817_v40  ;;  %v1960_v40 = vpop.eup %1959  ;;  %v3242_v49 = vld [vmem:[#allocation29_spill] sm:$0xff] }
 0x304   : > { %v3243_v35 = vsub.f32 %v3242_v49, %v2841_v61  ;;  %v821_v18 = vmul.f32 %v1960_v40, %v805_v37  ;;  %v1962_v39 = vpop.eup %1961  ;;  %v1225_v40 = vld [vmem:[%s2314_s1 + $0x18] sm:$0xff] (!%p1737_p5)  ;;  %v1238_v37 = vmul.f32 (!%p1737_p5), %v1222_v59, %v1206_v42  ;;  %v1207_v49 = vld [vmem:[%s2309_s22 + $0x8] sm:$0xff] (!%p1737_p5) }
 0x305   : > { %1074 = vst.msk [vmem:[#allocation3] sm:$0xff] %vm1073_vm4, %v1057_v58  ;;  %v3244_v58 = vld [vmem:[#allocation28_spill] sm:$0xff]  ;;  %v1964_v52 = vpop.eup %1963 }
 0x306   : > { %v1038_v23 = vpop.xlane.xlu1 %1037  ;;  %v783_v54 = vmul.f32 1.442695, %v3243_v35  ;;  %v3245_v8 = vsub.f32 %v3244_v58, %v2838_v4  ;;  %v1966_v4 = vpop.eup %1965  ;;  %v1223_v35 = vld [vmem:[%s2314_s1 + $0x8] sm:$0xff] (!%p1737_p5)  ;;  %v1210_v58 = vld [vmem:[%s2309_s22 + $0x20] sm:$0xff] (!%p1737_p5) }
 0x307   : > { %v1066_v9 = vadd.f32 %v1038_v23, %v826_v3  ;;  %v813_v23 = vld [vmem:[#allocation3 + $0x60] sm:$0xff]  ;;  %v1968_v63 = vpop.eup %1967 }
 0x308   : > { %v1035_v31 = vpop.xlane.xlu0 %1034  ;;  %v797_v3 = vmul.f32 1.442695, %v3245_v8  ;;  %1969 = vpow2.f32 %v783_v54  ;;  %v829_v61 = vmul.f32 %v1962_v39, %v813_v23  ;;  %v830_v22 = vmul.f32 %v1968_v63, %v814_v32  ;;  %v1211_v54 = vld [vmem:[%s2309_s22 + $0x28] sm:$0xff] (!%p1737_p5)  ;;  %v1230_v63 = vld [vmem:[%s2314_s1 + $0x40] sm:$0xff] (!%p1737_p5) }
 0x309   : > { %v1065_v60 = vadd.f32 %v1035_v31, %v825_v50  ;;  %1083 = vst.msk [vmem:[#allocation3 + $0x48] sm:$0xff] %vm1073_vm4, %v1066_v9  ;;  %v806_v9 = vld [vmem:[#allocation3 + $0x28] sm:$0xff]  ;;  %v1254_v39 = vsel (!%p1737_p5), %vm386_vm1, %v1238_v37, 0.0 }
 0x30a   : > { %1971 = vpow2.f32 %v797_v3  ;;  %v822_v27 = vmul.f32 %v1964_v52, %v806_v9  ;;  %1255 = vadd.xlane.f32.xlu0 (!%p1737_p5), %v1254_v39  ;;  %v1215_v9 = vld [vmem:[%s2309_s22 + $0x48] sm:$0xff] (!%p1737_p5) }
 0x30b   : > { %1082 = vst.msk [vmem:[#allocation3 + $0x40] sm:$0xff] %vm1073_vm4, %v1065_v60  ;;  %1973 = vpow2.f32 %v799_v19  ;;  %v807_v60 = vld [vmem:[#allocation3 + $0x30] sm:$0xff] }
 0x30c   : > { %v1014_v14 = vpop.xlane.xlu0 %1013  ;;  %v823_v45 = vmul.f32 %v1966_v4, %v807_v60  ;;  %v1212_v19 = vld [vmem:[%s2309_s22 + $0x30] sm:$0xff] (!%p1737_p5) }
 0x30d   : > { %v1058_v15 = vadd.f32 %v1014_v14, %v818_v7 }
 0x30f   : > { %1075 = vst.msk [vmem:[#allocation3 + $0x8] sm:$0xff] %vm1073_vm4, %v1058_v15 }
 0x310   : > { %v1017_v25 = vpop.xlane.xlu0 %1016  ;;  %v1327_v37 = vld [vmem:[#allocation3 + $0x48] sm:$0xff] (!%p1737_p5) }
 0x311   : > { %v1059_v12 = vadd.f32 %v1017_v25, %v819_v10 }
 0x312   : > { %v1970_v15 = vpop.eup %1969 }
 0x313   : > { %1076 = vst.msk [vmem:[#allocation3 + $0x10] sm:$0xff] %vm1073_vm4, %v1059_v12  ;;  %v824_v25 = vmul.f32 %v1970_v15, %v808_v6  ;;  %v1232_v15 = vld [vmem:[%s2314_s1 + $0x50] sm:$0xff] (!%p1737_p5) }
 0x314   : > { %v1041_v24 = vpop.xlane.xlu0 %1040  ;;  %v1972_v10 = vpop.eup %1971 }
 0x315   : > { %v1067_v47 = vadd.f32 %v1041_v24, %v827_v16  ;;  %v1974_v29 = vpop.eup %1973  ;;  %v831_v41 = vmul.f32 %v1972_v10, %v815_v48  ;;  %v1235_v10 = vld [vmem:[%s2314_s1 + $0x68] sm:$0xff] (!%p1737_p5) }
 0x316   : > { %v832_v16 = vmul.f32 %v1974_v29, %v816_v33  ;;  %v1218_v29 = vld [vmem:[%s2309_s22 + $0x60] sm:$0xff] (!%p1737_p5)  ;;  %v1319_v42 = vld [vmem:[#allocation3 + $0x8] sm:$0xff] (!%p1737_p5) }
 0x317   : > { %v1020_v21 = vpop.xlane.xlu1 %1019  ;;  %1084 = vst.msk [vmem:[#allocation3 + $0x50] sm:$0xff] %vm1073_vm4, %v1067_v47  ;;  %v1105_v47 = vld [vmem:[#allocation4 + $0x78] sm:$0xff] }
 0x318   : > { %v1060_v17 = vadd.f32 %v1020_v21, %v820_v20  ;;  %v1240_v21 = vmul.f32 (!%p1737_p5), %v1224_v38, %v1208_v51  ;;  %v1318_v38 = vld [vmem:[#allocation3] sm:$0xff] (!%p1737_p5) }
 0x319   : > { %1977 = vlog2.f32 (!%p1737_p5), %v1318_v38 }
 0x31a   : > { %1077 = vst.msk [vmem:[#allocation3 + $0x18] sm:$0xff] %vm1073_vm4, %v1060_v17  ;;  %v1209_v17 = vld [vmem:[%s2309_s22 + $0x18] sm:$0xff] (!%p1737_p5)  ;;  %1979 = vlog2.f32 (!%p1737_p5), %v1319_v42 }
 0x31b   : > { %v1044_v56 = vpop.xlane.xlu1 %1043  ;;  %v1023_v50 = vpop.xlane.xlu0 %1022 }
 0x31c   : > { %v1068_v28 = vadd.f32 %v1044_v56, %v828_v1  ;;  %v1061_v13 = vadd.f32 %v1023_v50, %v821_v18  ;;  %v1241_v1 = vmul.f32 (!%p1737_p5), %v1225_v40, %v1209_v17  ;;  %v1260_v56 = vsel (!%p1737_p5), %vm386_vm1, %v1240_v21, 0.0  ;;  %v1226_v50 = vld [vmem:[%s2314_s1 + $0x20] sm:$0xff] (!%p1737_p5)  ;;  %v1320_v21 = vld [vmem:[#allocation3 + $0x10] sm:$0xff] (!%p1737_p5) }
 0x31d   : > { %v1239_v18 = vmul.f32 (!%p1737_p5), %v1223_v35, %v1207_v49  ;;  %1261 = vadd.xlane.f32.xlu1 (!%p1737_p5), %v1260_v56  ;;  %v1242_v57 = vmul.f32 (!%p1737_p5), %v1226_v50, %v1210_v58  ;;  %1981 = vlog2.f32 (!%p1737_p5), %v1320_v21  ;;  %v1303_v58 = vld [vmem:[#allocation2 + $0x8] sm:$0xff] (!%p1737_p5)  ;;  %v1304_v50 = vld [vmem:[#allocation2 + $0x10] sm:$0xff] (!%p1737_p5) }
 0x31e   : > { %1085 = vst.msk [vmem:[#allocation3 + $0x58] sm:$0xff] %vm1073_vm4, %v1068_v28  ;;  %1078 = vst.msk [vmem:[#allocation3 + $0x20] sm:$0xff] %vm1073_vm4, %v1061_v13  ;;  %v1227_v28 = vld [vmem:[%s2314_s1 + $0x28] sm:$0xff] (!%p1737_p5)  ;;  %v1263_v8 = vsel (!%p1737_p5), %vm386_vm1, %v1241_v1, 0.0  ;;  %v1213_v13 = vld [vmem:[%s2309_s22 + $0x38] sm:$0xff] (!%p1737_p5) }
 0x31f   : > { %v1047_v31 = vpop.xlane.xlu0 %1046  ;;  %v1243_v3 = vmul.f32 (!%p1737_p5), %v1227_v28, %v1211_v54  ;;  %v1257_v23 = vsel (!%p1737_p5), %vm386_vm1, %v1239_v18, 0.0  ;;  %v1266_v4 = vsel (!%p1737_p5), %vm386_vm1, %v1242_v57, 0.0  ;;  %v1302_v54 = vld [vmem:[#allocation2] sm:$0xff] (!%p1737_p5) }
 0x320   : > { %v1069_v53 = vadd.f32 %v1047_v31, %v829_v61  ;;  %v1228_v61 = vld [vmem:[%s2314_s1 + $0x30] sm:$0xff] (!%p1737_p5)  ;;  %1258 = vadd.xlane.f32.xlu0 (!%p1737_p5), %v1257_v23  ;;  %v1245_v31 = vmul.f32 (!%p1737_p5), %v1229_v26, %v1213_v13 }
 0x321   : > { %1264 = vadd.xlane.f32.xlu1 (!%p1737_p5), %v1263_v8  ;;  %v1269_v52 = vsel (!%p1737_p5), %vm386_vm1, %v1243_v3, 0.0  ;;  %v1244_v60 = vmul.f32 (!%p1737_p5), %v1228_v61, %v1212_v19  ;;  %v1321_v59 = vld [vmem:[#allocation3 + $0x18] sm:$0xff] (!%p1737_p5) }
 0x322   : > { %1086 = vst.msk [vmem:[#allocation3 + $0x60] sm:$0xff] %vm1073_vm4, %v1069_v53  ;;  %v1231_v53 = vld [vmem:[%s2314_s1 + $0x48] sm:$0xff] (!%p1737_p5)  ;;  %1983 = vlog2.f32 (!%p1737_p5), %v1321_v59 }
 0x323   : > { %v1026_v34 = vpop.xlane.xlu1 %1025  ;;  %v1247_v32 = vmul.f32 (!%p1737_p5), %v1231_v53, %v1215_v9  ;;  %v1978_v17 = vpop.eup (!%p1737_p5), %1977  ;;  %v1305_v53 = vld [vmem:[#allocation2 + $0x18] sm:$0xff] (!%p1737_p5) }
 0x324   : > { %v1062_v7 = vadd.f32 %v1026_v34, %v822_v27  ;;  %v1214_v27 = vld [vmem:[%s2309_s22 + $0x40] sm:$0xff] (!%p1737_p5)  ;;  %v1275_v34 = vsel (!%p1737_p5), %vm386_vm1, %v1245_v31, 0.0  ;;  %1267 = vadd.xlane.f32.xlu0 (!%p1737_p5), %v1266_v4  ;;  %v1980_v1 = vpop.eup (!%p1737_p5), %1979  ;;  %v1335_v49 = vmul.f32 (!%p1737_p5), 0.6931472, %v1978_v17 }
 0x325   : > { %1270 = vadd.xlane.f32.xlu1 (!%p1737_p5), %v1269_v52  ;;  %v1322_v40 = vld [vmem:[#allocation3 + $0x20] sm:$0xff] (!%p1737_p5)  ;;  %v1329_v56 = vld [vmem:[#allocation3 + $0x58] sm:$0xff] (!%p1737_p5)  ;;  %v1337_v28 = vmul.f32 (!%p1737_p5), 0.6931472, %v1980_v1 }
 0x326   : > { %1079 = vst.msk [vmem:[#allocation3 + $0x28] sm:$0xff] %vm1073_vm4, %v1062_v7  ;;  %v1217_v7 = vld [vmem:[%s2309_s22 + $0x58] sm:$0xff] (!%p1737_p5)  ;;  %1985 = vlog2.f32 (!%p1737_p5), %v1322_v40  ;;  %v1366_v39 = vadd.f32 (!%p1737_p5), %v1335_v49, %v1302_v54  ;;  %v1414_v52 = vld [vmem:[#allocation4] sm:$0xff] (!%p1737_p5) }
 0x327   : > { %v1029_v46 = vpop.xlane.xlu0 %1028  ;;  %v1050_v2 = vpop.xlane.xlu1 %1049  ;;  %1987 = vlog2.f32 (!%p1737_p5), %v1327_v37  ;;  %v3038_v13 = vadd.f32 (!%p1737_p5), %v1337_v28, %v1303_v58  ;;  %v1418_v49 = vld [vmem:[#allocation4 + $0x20] sm:$0xff] (!%p1737_p5) }
 0x328   : > { %v1063_v14 = vadd.f32 %v1029_v46, %v823_v45  ;;  %v1070_v62 = vadd.f32 %v1050_v2, %v830_v22  ;;  %v1233_v45 = vld [vmem:[%s2314_s1 + $0x58] sm:$0xff] (!%p1737_p5)  ;;  %v1272_v46 = vsel (!%p1737_p5), %vm386_vm1, %v1244_v60, 0.0  ;;  %v1216_v22 = vld [vmem:[%s2309_s22 + $0x50] sm:$0xff] (!%p1737_p5)  ;;  %v1281_v2 = vsel (!%p1737_p5), %vm386_vm1, %v1247_v32, 0.0  ;;  %v1982_v18 = vpop.eup (!%p1737_p5), %1981 }
 0x329   : > { %1276 = vadd.xlane.f32.xlu1 (!%p1737_p5), %v1275_v34  ;;  %v1249_v6 = vmul.f32 (!%p1737_p5), %v1233_v45, %v1217_v7  ;;  %1273 = vadd.xlane.f32.xlu0 (!%p1737_p5), %v1272_v46  ;;  %v1339_v8 = vmul.f32 (!%p1737_p5), 0.6931472, %v1982_v18  ;;  %v1430_v57 = vmul.f32 (!%p1737_p5), 700.0, %v1366_v39  ;;  %v1431_v4 = vmul.f32 (!%p1737_p5), 700.0, %v3038_v13  ;;  %v1415_v34 = vld [vmem:[#allocation4 + $0x8] sm:$0xff] (!%p1737_p5) }
 0x32a   : > { %1080 = vst.msk [vmem:[#allocation3 + $0x30] sm:$0xff] %vm1073_vm4, %v1063_v14  ;;  %1087 = vst.msk [vmem:[#allocation3 + $0x68] sm:$0xff] %vm1073_vm4, %v1070_v62  ;;  %v1246_v14 = vmul.f32 (!%p1737_p5), %v1230_v63, %v1214_v27  ;;  %v1219_v62 = vld [vmem:[%s2309_s22 + $0x68] sm:$0xff] (!%p1737_p5) }
 0x32b   : > { %v1032_v12 = vpop.xlane.xlu1 %1031  ;;  %v1287_v33 = vsel (!%p1737_p5), %vm386_vm1, %v1249_v6, 0.0  ;;  %v1368_v61 = vadd.f32 (!%p1737_p5), %v1339_v8, %v1304_v50  ;;  %v1446_v63 = vsub.f32 (!%p1737_p5), %v1414_v52, %v1430_v57  ;;  %v1306_v6 = vld [vmem:[#allocation2 + $0x20] sm:$0xff] (!%p1737_p5)  ;;  %v1423_v52 = vld [vmem:[#allocation4 + $0x48] sm:$0xff] (!%p1737_p5) }
 0x32c   : > { %v1064_v55 = vadd.f32 %v1032_v12, %v824_v25  ;;  %v1278_v48 = vsel (!%p1737_p5), %vm386_vm1, %v1246_v14, 0.0  ;;  %v1248_v25 = vmul.f32 (!%p1737_p5), %v1232_v15, %v1216_v22  ;;  %v1234_v12 = vld [vmem:[%s2314_s1 + $0x60] sm:$0xff] (!%p1737_p5)  ;;  %v1984_v3 = vpop.eup (!%p1737_p5), %1983  ;;  %v1416_v15 = vld [vmem:[#allocation4 + $0x10] sm:$0xff] (!%p1737_p5) }
 0x32d   : > { %1282 = vadd.xlane.f32.xlu1 (!%p1737_p5), %v1281_v2  ;;  %1279 = vadd.xlane.f32.xlu0 (!%p1737_p5), %v1278_v48  ;;  %v1323_v35 = vld [vmem:[#allocation3 + $0x28] sm:$0xff] (!%p1737_p5)  ;;  %v1341_v31 = vmul.f32 (!%p1737_p5), 0.6931472, %v1984_v3  ;;  %v1432_v7 = vmul.f32 (!%p1737_p5), 700.0, %v1368_v61  ;;  %v1326_v14 = vld [vmem:[#allocation3 + $0x40] sm:$0xff] (!%p1737_p5) }
 0x32e   : > { %1081 = vst.msk [vmem:[#allocation3 + $0x38] sm:$0xff] %vm1073_vm4, %v1064_v55  ;;  %v1251_v55 = vmul.f32 (!%p1737_p5), %v1235_v10, %v1219_v62  ;;  %1989 = vlog2.f32 (!%p1737_p5), %v1323_v35  ;;  %v1447_v10 = vsub.f32 (!%p1737_p5), %v1415_v34, %v1431_v4  ;;  %v1309_v4 = vld [vmem:[#allocation2 + $0x38] sm:$0xff] (!%p1737_p5) }
 0x32f   : > { %v1053_v0 = vpop.xlane.xlu0 %1052  ;;  %v1056_v5 = vpop.xlane.xlu1 %1055  ;;  %1991 = vlog2.f32 (!%p1737_p5), %v1329_v56  ;;  %v3041_v45 = vadd.f32 (!%p1737_p5), %v1341_v31, %v1305_v53  ;;  %v1330_v56 = vld [vmem:[#allocation3 + $0x60] sm:$0xff] (!%p1737_p5)  ;;  %v1315_v31 = vld [vmem:[#allocation2 + $0x68] sm:$0xff] (!%p1737_p5) }
 0x330   : > { %v1071_v43 = vadd.f32 %v1053_v0, %v831_v41  ;;  %v1072_v44 = vadd.f32 %v1056_v5, %v832_v16  ;;  %1205 = sbr.rel (%p1737_p5) target bundleno = 1117 (0x45d), region = 63  ;;  %v1221_v41 = vld [vmem:[%s2309_s22 + $0x78] sm:$0xff] (!%p1737_p5)  ;;  %v1250_v16 = vmul.f32 (!%p1737_p5), %v1234_v12, %v1218_v29  ;;  %v1220_v5 = vld [vmem:[%s2309_s22 + $0x70] sm:$0xff] (!%p1737_p5)  ;;  %v1986_v9 = vpop.eup (!%p1737_p5), %1985  ;;  %v1419_v53 = vld [vmem:[#allocation4 + $0x28] sm:$0xff] (!%p1737_p5) }
 0x331   : > { %v1237_v0 = vld [vmem:[%s2314_s1 + $0x78] sm:$0xff] (!%p1737_p5)  ;;  %1288 = vadd.xlane.f32.xlu1 (!%p1737_p5), %v1287_v33  ;;  %v1324_v23 = vld [vmem:[#allocation3 + $0x30] sm:$0xff] (!%p1737_p5)  ;;  %v1331_v26 = vld [vmem:[#allocation3 + $0x68] sm:$0xff] (!%p1737_p5)  ;;  %v1988_v27 = vpop.eup (!%p1737_p5), %1987  ;;  %v1343_v46 = vmul.f32 (!%p1737_p5), 0.6931472, %v1986_v9 }
 0x332   : > { %1088 = vst.msk [vmem:[#allocation3 + $0x70] sm:$0xff] %vm1073_vm4, %v1071_v43  ;;  %1089 = vst.msk [vmem:[#allocation3 + $0x78] sm:$0xff] %vm1073_vm4, %v1072_v44  ;;  %v1284_v43 = vsel (!%p1737_p5), %vm386_vm1, %v1248_v25, 0.0  ;;  %v2125_v44 = vmov (!%p1737_p5), 0   ;;  %1993 = vlog2.f32 (!%p1737_p5), %v1324_v23  ;;  %v1353_v48 = vmul.f32 (!%p1737_p5), 0.6931472, %v1988_v27 }
 0x333   : > { %v1150_v24 = vpop.xlane.xlu0 %1149  ;;  %v1153_v36 = vpop.xlane.xlu1 %1152  ;;  %1975 = vset.pattern.permute.xlu0 (!%p1737_p5), %v2125_v44  ;;  %1976 = vset.pattern.permute.xlu1 (!%p1737_p5), %v2125_v44  ;;  %1995 = vlog2.f32 (!%p1737_p5), %v1331_v26  ;;  %v1462_v25 = vmul.f32 (!%p1737_p5), 0.00028612305, %v1446_v63  ;;  %v1311_v33 = vld [vmem:[#allocation2 + $0x48] sm:$0xff] (!%p1737_p5) }
 0x334   : > { %v1168_v20 = vadd.f32 %v1150_v24, %v1104_v11  ;;  %v1169_v30 = vadd.f32 %v1153_v36, %v1105_v47  ;;  %v1236_v11 = vld [vmem:[%s2314_s1 + $0x70] sm:$0xff] (!%p1737_p5)  ;;  %v1293_v24 = vsel (!%p1737_p5), %vm386_vm1, %v1251_v55, 0.0  ;;  %v1253_v47 = vmul.f32 (!%p1737_p5), %v1237_v0, %v1221_v41  ;;  %1285 = vadd.xlane.f32.xlu0 (!%p1737_p5), %v1284_v43  ;;  %v1307_v0 = vld [vmem:[#allocation2 + $0x28] sm:$0xff] (!%p1737_p5) }
 0x335   : > { %v1252_v36 = vmul.f32 (!%p1737_p5), %v1236_v11, %v1220_v5  ;;  %1294 = vadd.xlane.f32.xlu1 (!%p1737_p5), %v1293_v24  ;;  %v1325_v19 = vld [vmem:[#allocation3 + $0x38] sm:$0xff] (!%p1737_p5)  ;;  %v1448_v55 = vsub.f32 (!%p1737_p5), %v1416_v15, %v1432_v7  ;;  %v1433_v41 = vmul.f32 (!%p1737_p5), 700.0, %v3041_v45  ;;  %v3044_v43 = vadd.f32 (!%p1737_p5), %v1343_v46, %v1306_v6  ;;  %v1328_v5 = vld [vmem:[#allocation3 + $0x50] sm:$0xff] (!%p1737_p5) }
 0x336   : > { %1184 = vst.msk [vmem:[#allocation4 + $0x70] sm:$0xff] %vm1073_vm4, %v1168_v20  ;;  %1185 = vst.msk [vmem:[#allocation4 + $0x78] sm:$0xff] %vm1073_vm4, %v1169_v30  ;;  %v1290_v20 = vsel (!%p1737_p5), %vm386_vm1, %v1250_v16, 0.0  ;;  %v1299_v30 = vsel (!%p1737_p5), %vm386_vm1, %v1253_v47, 0.0  ;;  %1997 = vlog2.f32 (!%p1737_p5), %v1325_v19  ;;  %v1417_v24 = vld [vmem:[#allocation4 + $0x18] sm:$0xff] (!%p1737_p5)  ;;  %v3046_v38 = vadd.f32 (!%p1737_p5), %v1353_v48, %v1311_v33 }
 0x337   : > { %v1296_v51 = vsel %vm386_vm1, %v1252_v36, 0.0  ;;  %v1464_v37 = vmul.f32 0.00028612305, %v1448_v55  ;;  %v1449_v1 = vsub.f32 %v1417_v24, %v1433_v41  ;;  %v1434_v35 = vmul.f32 700.0, %v3044_v43  ;;  %v1425_v46 = vld [vmem:[#allocation4 + $0x58] sm:$0xff] }
 0x338   : > { %1291 = vadd.xlane.f32.xlu0 %v1290_v20  ;;  %v1990_v32 = vpop.eup %1989  ;;  %v1313_v20 = vld [vmem:[#allocation2 + $0x58] sm:$0xff]  ;;  %v1439_v3 = vmul.f32 700.0, %v3046_v38 }
 0x339   : > { %1300 = vadd.xlane.f32.xlu1 %v1299_v30  ;;  %v1333_v60 = vld [vmem:[#allocation3 + $0x78] sm:$0xff]  ;;  %v1992_v22 = vpop.eup %1991  ;;  %v1345_v12 = vmul.f32 0.6931472, %v1990_v32  ;;  %v1463_v30 = vmul.f32 0.00028612305, %v1447_v10 }
 0x33a   : > { %1999 = vlog2.f32 %v1333_v60  ;;  %v1357_v16 = vmul.f32 0.6931472, %v1992_v22  ;;  %v1465_v9 = vmul.f32 0.00028612305, %v1449_v1  ;;  %v1450_v60 = vsub.f32 %v1418_v49, %v1434_v35  ;;  %v1332_v22 = vld [vmem:[#allocation3 + $0x70] sm:$0xff]  ;;  %v1317_v48 = vld [vmem:[#allocation2 + $0x78] sm:$0xff] }
 0x33b   : > { %2001 = vlog2.f32 %v1326_v14  ;;  %v3049_v17 = vadd.f32 %v1345_v12, %v1307_v0  ;;  %v1455_v15 = vsub.f32 %v1423_v52, %v1439_v3 }
 0x33c   : > { %1297 = vadd.xlane.f32.xlu0 %v1296_v51  ;;  %v1994_v36 = vpop.eup %1993  ;;  %2003 = vlog2.f32 %v1328_v5  ;;  %v3052_v54 = vadd.f32 %v1357_v16, %v1313_v20  ;;  %v1420_v20 = vld [vmem:[#allocation4 + $0x30] sm:$0xff] }
 0x33d   : > { %v1996_v42 = vpop.eup %1995  ;;  %v1347_v8 = vmul.f32 0.6931472, %v1994_v36  ;;  %v1435_v19 = vmul.f32 700.0, %v3049_v17  ;;  %2005 = vlog2.f32 %v1330_v56 }
 0x33e   : > { %v1361_v23 = vmul.f32 0.6931472, %v1996_v42  ;;  %v1441_v27 = vmul.f32 700.0, %v3052_v54  ;;  %2007 = vlog2.f32 %v1332_v22 }
 0x340   : > { %v1998_v40 = vpop.eup %1997 }
 0x344   : > { %v2000_v26 = vpop.eup %1999 }
 0x345   : > { %v2002_v63 = vpop.eup %2001  ;;  %v1365_v6 = vmul.f32 0.6931472, %v2000_v26 }
 0x346   : > { %v1351_v33 = vmul.f32 0.6931472, %v2002_v63  ;;  %v2004_v55 = vpop.eup %2003 }
 0x347   : > { %v1381_v36 = vadd.f32 %v1365_v6, %v1317_v48  ;;  %v1355_v1 = vmul.f32 0.6931472, %v2004_v55  ;;  %v2006_v49 = vpop.eup %2005 }
 0x397   : > { %v1256_v62 = vpop.xlane.xlu0 %1255 }
 0x398   : > { %v1382_v29 = vsub.f32 %v1256_v62, %v1366_v39  ;;  %v1451_v62 = vsub.f32 %v1419_v53, %v1435_v19 }
 0x39a   : > { %v1398_v44 = vmul.f32 -0.79971385, %v1382_v29  ;;  %v1457_v29 = vsub.f32 %v1425_v46, %v1441_v27  ;;  %v1314_v27 = vld [vmem:[#allocation2 + $0x60] sm:$0xff] }
 0x39c   : > { %v1478_v21 = vsub.f32 %v1398_v44, %v1462_v25  ;;  %v1466_v25 = vmul.f32 0.00028612305, %v1450_v60  ;;  %v1471_v44 = vmul.f32 0.00028612305, %v1455_v15  ;;  %v1422_v60 = vld [vmem:[#allocation4 + $0x40] sm:$0xff] }
 0x39e   : > { %1496 = vperm.xlu0 %1975, %v1478_v21   ;;  %v1427_v21 = vld [vmem:[#allocation4 + $0x68] sm:$0xff] }
 0x3aa   : > { %v1262_v2 = vpop.xlane.xlu1 %1261 }
 0x3ab   : > { %v1384_v11 = vsub.f32 %v1262_v2, %v1368_v61  ;;  %v1349_v61 = vmul.f32 0.6931472, %v1998_v40  ;;  %v3061_v2 = vadd.f32 %v1361_v23, %v1315_v31  ;;  %v1473_v40 = vmul.f32 0.00028612305, %v1457_v29  ;;  %v1424_v29 = vld [vmem:[#allocation4 + $0x50] sm:$0xff] }
 0x3ad   : > { %v1259_v51 = vpop.xlane.xlu0 %1258  ;;  %v1400_v18 = vmul.f32 -0.79971385, %v1384_v11  ;;  %v3063_v10 = vadd.f32 %v1349_v61, %v1309_v4  ;;  %v1310_v11 = vld [vmem:[#allocation2 + $0x40] sm:$0xff]  ;;  %v1359_v61 = vmul.f32 0.6931472, %v2006_v49 }
 0x3ae   : > { %v1265_v47 = vpop.xlane.xlu1 %1264  ;;  %v1383_v59 = vsub.f32 %v1259_v51, %v3038_v13  ;;  %v1308_v13 = vld [vmem:[#allocation2 + $0x30] sm:$0xff]  ;;  %v1421_v51 = vld [vmem:[#allocation4 + $0x38] sm:$0xff] }
 0x3af   : > { %v1385_v28 = vsub.f32 %v1265_v47, %v3041_v45  ;;  %v1480_v34 = vsub.f32 %v1400_v18, %v1464_v37  ;;  %v1372_v14 = vadd.f32 %v1347_v8, %v1308_v13  ;;  %v1443_v47 = vmul.f32 700.0, %v3061_v2  ;;  %v1429_v13 = vld [vmem:[#allocation4 + $0x78] sm:$0xff] }
 0x3b0   : > { %v1399_v39 = vmul.f32 -0.79971385, %v1383_v59  ;;  %v1437_v42 = vmul.f32 700.0, %v3063_v10 }
 0x3b1   : > { %v1268_v50 = vpop.xlane.xlu0 %1267  ;;  %v1401_v32 = vmul.f32 -0.79971385, %v1385_v28  ;;  %v1436_v5 = vmul.f32 700.0, %v1372_v14  ;;  %v1459_v3 = vsub.f32 %v1427_v21, %v1443_v47 }
 0x3b2   : > { %v1271_v58 = vpop.xlane.xlu1 %1270  ;;  %v1479_v57 = vsub.f32 %v1399_v39, %v1463_v30  ;;  %v1386_v45 = vsub.f32 %v1268_v50, %v3044_v43  ;;  %v1467_v30 = vmul.f32 0.00028612305, %v1451_v62  ;;  %v1312_v39 = vld [vmem:[#allocation2 + $0x50] sm:$0xff]  ;;  %v1445_v50 = vmul.f32 700.0, %v1381_v36 }
 0x3b3   : > { %v1481_v41 = vsub.f32 %v1401_v32, %v1465_v9  ;;  %v1387_v0 = vsub.f32 %v1271_v58, %v3049_v17  ;;  %v1374_v17 = vadd.f32 %v1351_v33, %v1310_v11  ;;  %v1453_v23 = vsub.f32 %v1421_v51, %v1437_v42 }
 0x3b4   : > { %1501 = vperm.xlu1 %1976, %v1479_v57   ;;  %v1402_v16 = vmul.f32 -0.79971385, %v1386_v45  ;;  %v1376_v19 = vadd.f32 %v1355_v1, %v1312_v39  ;;  %v1461_v45 = vsub.f32 %v1429_v13, %v1445_v50  ;;  %v1378_v62 = vadd.f32 %v1359_v61, %v1314_v27 }
 0x3b5   : > { %v1403_v35 = vmul.f32 -0.79971385, %v1387_v0  ;;  %v1438_v57 = vmul.f32 700.0, %v1374_v17  ;;  %v1316_v0 = vld [vmem:[#allocation2 + $0x70] sm:$0xff] }
 0x3b6   : > { %v3058_v7 = vpop.xlane.xlu1 %1276  ;;  %v1274_v12 = vpop.xlane.xlu0 %1273  ;;  %v1482_v56 = vsub.f32 %v1402_v16, %v1466_v25  ;;  %v1440_v6 = vmul.f32 700.0, %v1376_v19  ;;  %v1477_v55 = vmul.f32 0.00028612305, %v1461_v45 }
 0x3b7   : > { %v1388_v28 = vsub.f32 %v1274_v12, %v1372_v14  ;;  %v1483_v52 = vsub.f32 %v1403_v35, %v1467_v30  ;;  %v1389_v31 = vsub.f32 %v3058_v7, %v3063_v10  ;;  %v1469_v14 = vmul.f32 0.00028612305, %v1453_v23 }
 0x3b8   : > { %1506 = vperm.xlu1 %1976, %v1480_v34   ;;  %v1475_v34 = vmul.f32 0.00028612305, %v1459_v3  ;;  %v1454_v15 = vsub.f32 %v1422_v60, %v1438_v57  ;;  %v1456_v16 = vsub.f32 %v1424_v29, %v1440_v6 }
 0x3b9   : > { %v1404_v4 = vmul.f32 -0.79971385, %v1388_v28  ;;  %v1405_v7 = vmul.f32 -0.79971385, %v1389_v31 }
 0x3ba   : > { %v1283_v43 = vpop.xlane.xlu1 %1282  ;;  %v1280_v37 = vpop.xlane.xlu0 %1279  ;;  %v1472_v42 = vmul.f32 0.00028612305, %v1456_v16 }
 0x3bb   : > { %v1391_v24 = vsub.f32 %v1283_v43, %v3046_v38  ;;  %v1452_v38 = vsub.f32 %v1420_v20, %v1436_v5  ;;  %v1390_v25 = vsub.f32 %v1280_v37, %v1374_v17  ;;  %v1470_v43 = vmul.f32 0.00028612305, %v1454_v15  ;;  %v1426_v20 = vld [vmem:[#allocation4 + $0x60] sm:$0xff]  ;;  %v1428_v37 = vld [vmem:[#allocation4 + $0x70] sm:$0xff] }
 0x3bc   : > { %1511 = vperm.xlu1 %1976, %v1481_v41   ;;  %v1442_v5 = vmul.f32 700.0, %v1378_v62 }
 0x3bd   : > { %v1407_v59 = vmul.f32 -0.79971385, %v1391_v24  ;;  %v1468_v53 = vmul.f32 0.00028612305, %v1452_v38  ;;  %v1406_v24 = vmul.f32 -0.79971385, %v1390_v25 }
 0x3be   : > { %v1289_v18 = vpop.xlane.xlu1 %1288  ;;  %v1458_v21 = vsub.f32 %v1426_v20, %v1442_v5 }
 0x3bf   : > { %v1487_v58 = vsub.f32 %v1407_v59, %v1471_v44  ;;  %v1393_v8 = vsub.f32 %v1289_v18, %v3052_v54  ;;  %v2008_v54 = vpop.eup %2007  ;;  %v1484_v10 = vsub.f32 %v1404_v4, %v1468_v53  ;;  %v1485_v44 = vsub.f32 %v1405_v7, %v1469_v14 }
 0x3c0   : > { %1516 = vperm.xlu1 %1976, %v1482_v56   ;;  %v1363_v12 = vmul.f32 0.6931472, %v2008_v54  ;;  %v1486_v59 = vsub.f32 %v1406_v24, %v1470_v43  ;;  %v1474_v49 = vmul.f32 0.00028612305, %v1458_v21 }
 0x3c1   : > { %v1409_v26 = vmul.f32 -0.79971385, %v1393_v8  ;;  %1541 = vperm.xlu0 %1975, %v1487_v58   ;;  %v1286_v46 = vpop.xlane.xlu0 %1285 }
 0x3c2   : > { %v1295_v9 = vpop.xlane.xlu1 %1294  ;;  %v1392_v47 = vsub.f32 %v1286_v46, %v1376_v19  ;;  %v1380_v30 = vadd.f32 %v1363_v12, %v1316_v0 }
 0x3c3   : > { %v1489_v63 = vsub.f32 %v1409_v26, %v1473_v40  ;;  %v1395_v32 = vsub.f32 %v1295_v9, %v3061_v2 }
 0x3c4   : > { %1521 = vperm.xlu1 %1976, %v1483_v52   ;;  %v1444_v17 = vmul.f32 700.0, %v1380_v30 }
 0x3c5   : > { %v1411_v22 = vmul.f32 -0.79971385, %v1395_v32  ;;  %1551 = vperm.xlu0 %1975, %v1489_v63   ;;  %v1292_v11 = vpop.xlane.xlu0 %1291 }
 0x3c6   : > { %v1301_v48 = vpop.xlane.xlu1 %1300  ;;  %v1394_v40 = vsub.f32 %v1292_v11, %v1378_v62  ;;  %v1460_v18 = vsub.f32 %v1428_v37, %v1444_v17 }
 0x3c7   : > { %v1491_v33 = vsub.f32 %v1411_v22, %v1475_v34  ;;  %v1397_v41 = vsub.f32 %v1301_v48, %v1381_v36  ;;  %v1408_v36 = vmul.f32 -0.79971385, %v1392_v47 }
 0x3c8   : > { %1526 = vperm.xlu1 %1976, %v1484_v10   ;;  %v1410_v56 = vmul.f32 -0.79971385, %v1394_v40  ;;  %v1476_v39 = vmul.f32 0.00028612305, %v1460_v18 }
 0x3c9   : > { %v1413_v2 = vmul.f32 -0.79971385, %v1397_v41  ;;  %1561 = vperm.xlu0 %1975, %v1491_v33   ;;  %v1298_v1 = vpop.xlane.xlu0 %1297  ;;  %v1488_v35 = vsub.f32 %v1408_v36, %v1472_v42 }
 0x3ca   : > { %v1396_v38 = vsub.f32 %v1298_v1, %v1380_v30  ;;  %v1490_v28 = vsub.f32 %v1410_v56, %v1474_v49 }
 0x3cb   : > { %v1493_v51 = vsub.f32 %v1413_v2, %v1477_v55 }
 0x3cc   : > { %1531 = vperm.xlu1 %1976, %v1485_v44   ;;  %v1412_v58 = vmul.f32 -0.79971385, %v1396_v38 }
 0x3cd   : > { %1571 = vperm.xlu0 %1975, %v1493_v51  }
 0x3ce   : > { %v1492_v8 = vsub.f32 %v1412_v58, %v1476_v39 }
 0x3d0   : > { %1536 = vperm.xlu1 %1976, %v1486_v59  }
 0x3d4   : > { %1546 = vperm.xlu1 %1976, %v1488_v35  }
 0x3d8   : > { %1556 = vperm.xlu1 %1976, %v1490_v28  }
 0x3dc   : > { %1566 = vperm.xlu1 %1976, %v1492_v8  }
 0x41d   : > { %v1497_v3 = vpop.permute.xlu0 %1496 }
 0x41e   : > { %1574 = vst [vmem:[%s2318_s15] sm:$0xff] %v1497_v3 }
 0x433   : > { %v1502_v50 = vpop.permute.xlu1 %1501 }
 0x434   : > { %1575 = vst [vmem:[%s2318_s15 + $0x8] sm:$0xff] %v1502_v50 }
 0x437   : > { %v1507_v23 = vpop.permute.xlu1 %1506 }
 0x438   : > { %1576 = vst [vmem:[%s2318_s15 + $0x10] sm:$0xff] %v1507_v23 }
 0x43b   : > { %v1512_v13 = vpop.permute.xlu1 %1511 }
 0x43c   : > { %1577 = vst [vmem:[%s2318_s15 + $0x18] sm:$0xff] %v1512_v13 }
 0x43f   : > { %v1517_v57 = vpop.permute.xlu1 %1516 }
 0x440   : > { %v1542_v26 = vpop.permute.xlu0 %1541  ;;  %1578 = vst [vmem:[%s2318_s15 + $0x20] sm:$0xff] %v1517_v57 }
 0x441   : > { %1583 = vst [vmem:[%s2318_s15 + $0x48] sm:$0xff] %v1542_v26 }
 0x443   : > { %v1522_v61 = vpop.permute.xlu1 %1521 }
 0x444   : > { %v1552_v19 = vpop.permute.xlu0 %1551  ;;  %1579 = vst [vmem:[%s2318_s15 + $0x28] sm:$0xff] %v1522_v61 }
 0x445   : > { %1585 = vst [vmem:[%s2318_s15 + $0x58] sm:$0xff] %v1552_v19 }
 0x447   : > { %v1527_v31 = vpop.permute.xlu1 %1526 }
 0x448   : > { %v1562_v52 = vpop.permute.xlu0 %1561  ;;  %1580 = vst [vmem:[%s2318_s15 + $0x30] sm:$0xff] %v1527_v31 }
 0x449   : > { %1587 = vst [vmem:[%s2318_s15 + $0x68] sm:$0xff] %v1562_v52 }
 0x44b   : > { %v1532_v53 = vpop.permute.xlu1 %1531 }
 0x44c   : > { %v1572_v9 = vpop.permute.xlu0 %1571  ;;  %1581 = vst [vmem:[%s2318_s15 + $0x38] sm:$0xff] %v1532_v53 }
 0x44d   : > { %1589 = vst [vmem:[%s2318_s15 + $0x78] sm:$0xff] %v1572_v9 }
 0x44f   : > { %v1537_v4 = vpop.permute.xlu1 %1536 }
 0x450   : > { %1582 = vst [vmem:[%s2318_s15 + $0x40] sm:$0xff] %v1537_v4 }
 0x453   : > { %v1547_v60 = vpop.permute.xlu1 %1546 }
 0x454   : > { %1584 = vst [vmem:[%s2318_s15 + $0x50] sm:$0xff] %v1547_v60 }
 0x457   : > { %v1557_v27 = vpop.permute.xlu1 %1556 }
 0x458   : > { %1586 = vst [vmem:[%s2318_s15 + $0x60] sm:$0xff] %v1557_v27 }
 0x45b   : > { %v1567_v54 = vpop.permute.xlu1 %1566 }
 0x45c   : > { %1588 = vst [vmem:[%s2318_s15 + $0x70] sm:$0xff] %v1567_v54 }
 0x45d PF: > { %s1744_s1 = sshll.u32 %s2107_s18, 11  ;;  %s1604_s4 = sshll.u32 %s2318_s15, 4  ;;  %s3096_s4 = int_to_ptr.vmem [resolvable:$true] %s1604_s4 }
 0x45e   : > { %s3093_s29 = scalar_lea.hbm %s3161_s3, %s1744_s1  ;;  %s3100_s8 = scalar_lea.sflag [#allocation7], %s276_s28 }
 0x45f   : > { %s2009_s9 = scalar_lea.vmem %s3096_s4, 2048  ;;  %s2126_s18 = smov [#allocation6]  }
 0x460   : > { %p2010_p6 = scmp.ne.s32.totalorder %s3096_s4, %s2009_s9  ;;  %s2013_s10 = sshll.u32 %s2126_s18, 4  ;;  %s2014_s10 = int_to_ptr.vmem [resolvable:$false] %s2013_s10 }
 0x461   : > { %s2015_s11 = scalar_lea.vmem %s2014_s10, 4096  ;;  %p2016_p9 = scmp.lt.s32.totalorder %s3096_s4, %s2014_s10 }
 0x462   : > { %p2011_p7 = pnand %p2010_p6, %p2228_p10  ;;  %p2017_p11 = scmp.lt.s32.totalorder %s2015_s11, %s2009_s9 }
 0x464   : > { %p2012_p8 = pneg %p2011_p7  ;;  %p2018_p13 = por %p2017_p11, %p2016_p9 }
 0x466   : > { %p2019_p0 = pnand %p2018_p13, %p2012_p8 }
 0x468   : > { %2022 = shalt.err (!%p2019_p0)
}
 0x469   : > { %s2023_s28 = scalar_lea.hbm %s3093_s29, 2048  ;;  %s2027_s26 = scalar_lea.hbm %s3161_s3, 4096 }
 0x46a   : > { %p2024_p1 = scmp.ne.s32.totalorder %s3093_s29, %s2023_s28  ;;  %p2028_p4 = scmp.lt.u32.totalorder %s3093_s29, %s3161_s3 }
 0x46b   : > { %p2029_p5 = scmp.lt.u32.totalorder %s2027_s26, %s2023_s28  ;;  %p2031_p7 = scmp.lt.u32.totalorder %s2023_s28, %s3093_s29 }
 0x46c   : > { %p2025_p2 = pnand %p2024_p1, %p2228_p10 }
 0x46d   : > { %p2030_p6 = por %p2029_p5, %p2028_p4 }
 0x46e   : > { %p2026_p3 = pneg %p2025_p2 }
 0x46f   : > { %p2032_p8 = por %p2031_p7, %p2030_p6 }
 0x471   : > { %p2033_p9 = pnand %p2032_p8, %p2026_p3 }
 0x473   : > { %2036 = shalt.err (!%p2033_p9)
}
 0x474   : > { %s2127_s1 = smov 128   ;;  %s2128_s17 = smov 8  }
 0x475   : > { %1783 = dma.vmem_to_hbm [thread:$0]  (%p2228_p10), %s3096_s4, 2048, %s3093_s29, %s3100_s8, %s2127_s1, %s2127_s1, %s2128_s17  }
 0x476 PF: > { %p1789_p11 = scmp.ge.s32.totalorder %s2119_s21, 2  ;;  %s1619_s27 = sand.u32 1, %s2083_s12  }
 0x477   : > { %s1620_s9 = scalar_lea.sflag [#allocation7], %s1619_s27 }
 0x478   : > { %p1786_p13 = pnand %p1789_p11, %p2235_p12 }
 0x47a   : > { %2078 = dma.done.wait (!%p1786_p13), %s1620_s9, 2048  }
 0x47b   : > { %2080 = vsyncadd (!%p1786_p13), %s1620_s9, 4294965248  ;;  %s16_s21 = sadd.s32 1, %s2119_s21   ;;  %s3248_s5 = sld [smem:[#allocation9_spill]] }
 0x47c   : > { %p13_p0 = scmp.ge.s32.totalorder %s16_s21, 8   ;;  %s3249_s12 = smov %s2087_s13 }
 0x47d   : > { %s3250_s13 = smov %s2091_s14  ;;  %s3251_s14 = smov %s2233_s6 }
 0x47e   : > { %s3252_s15 = smov %s2099_s16  ;;  %s3253_s16 = smov %s2222_s30 }
 0x47f   : > { %s3254_s17 = smov %s2111_s19  ;;  %s3255_s18 = smov %s2115_s20 }
 0x480   : > { %s3256_s19 = smov %s3259_s24  ;;  %15 = sbr.rel (!%p13_p0) target bundleno = 8 (0x8), region = 109 }
 0x481   : > { %s3257_s20 = smov %s3248_s5 }
 0x487   :  { %1625 = vsyncpa [#allocation7], 1 }
 0x488   :  { %1627 = vsyncpa [#allocation7 + $0x1], 1 }

</bundles_post_ra>
